<compile_context>
chip_gen: v5e
topology: v5e:2x2
jax: 0.10.0
libtpu: 0.0.40
codegen_flags: <defaults>
</compile_context>

<pallas_src>
import functools

import numpy as np
import jax
import jax.numpy as jnp
from jax import lax
from jax.experimental import pallas as pl
from jax.experimental.pallas import tpu as pltpu


# ----------------------------------------------------------------------------
# Pallas kernel: fused multi-direction anti-diagonal (wavefront) 2-D LSTM scan.
# ----------------------------------------------------------------------------
def _mdlstm_wavefront_kernel(gx_ref, u_ref, h_out_ref, c_out_ref,
                             fb_h, fb_c, *, batch, pad):
    # gx_ref   : (Wp, D, H*B, 5*O) f32  pre-computed x@W + b, skewed so that
    #                                   anti-diagonal d is the slab gx_ref[d]
    # u_ref    : (D, 2*O, 5*O)     f32  per-direction stacked [U0; U1]
    # h_out_ref: (Wp, D, H*B, O)   f32  skewed hidden-state map
    # c_out_ref: (Wp, D, H*B, O)   f32  skewed cell-state map
    # fb_h/fb_c: (D, pad+H*B, O)   f32  wavefront (previous-diagonal) buffers;
    #                                   rows [0, pad) stay zero forever and
    #                                   provide the y == 0 boundary state.
    n_diag, _, HB, O = h_out_ref.shape

    # Zero initial wavefront (also zeroes the permanent top-boundary rows).
    fb_h[...] = jnp.zeros_like(fb_h)
    fb_c[...] = jnp.zeros_like(fb_c)

    def step(d, carry):
        # Previous diagonal's states (static slices of the wavefront buffer).
        h_left = fb_h[:, pad:, :]                         # (y,   x-1)
        c_left = fb_c[:, pad:, :]
        h_up = fb_h[:, pad - batch:pad - batch + HB, :]   # (y-1, x)
        c_up = fb_c[:, pad - batch:pad - batch + HB, :]

        # One fused recurrent matmul per direction: [h_up, h_left] @ [U0; U1],
        # added to the hoisted input projection for this diagonal.
        lhs = jnp.concatenate([h_up, h_left], axis=-1)    # (D, H*B, 2*O)
        gates = gx_ref[d] + jnp.einsum(
            'dnk,dko->dno', lhs, u_ref[...],
            preferred_element_type=jnp.float32)           # (D, H*B, 5*O)

        # One sigmoid over the full 5*O gate vector; tanh only on the g chunk.
        sig = jax.nn.sigmoid(gates)
        it = sig[..., 0 * O:1 * O]
        ft = sig[..., 1 * O:2 * O]
        ot = sig[..., 3 * O:4 * O]
        lt = sig[..., 4 * O:5 * O]
        gt = jnp.tanh(gates[..., 2 * O:3 * O])

        c_new = ft * (lt * c_up + (1.0 - lt) * c_left) + it * gt
        h_new = ot * jnp.tanh(c_new)

        # Rows with x = d - y < 0 lie left of the image: keep them zero so the
        # x == 0 cells of the next diagonal read a zero left-boundary state.
        keep = lax.broadcasted_iota(jnp.int32, h_new.shape, 1) < (d + 1) * batch
        h_new = jnp.where(keep, h_new, 0.0)
        c_new = jnp.where(keep, c_new, 0.0)

        # New wavefront + dense per-diagonal output store.
        fb_h[:, pad:, :] = h_new
        fb_c[:, pad:, :] = c_new
        h_out_ref[d] = h_new
        c_out_ref[d] = c_new
        return carry

    lax.fori_loop(0, n_diag, step, 0)


# ----------------------------------------------------------------------------
# Wrapper helpers: flips + diagonal skewing (pure data movement in XLA).
# ----------------------------------------------------------------------------
def _flip_hw(img, direction):
    """img has layout (H, W, ...). 0=identity, 1=flip W, 2=flip H, 3=both."""
    if direction == 0:
        return img
    if direction == 1:
        return jnp.flip(img, axis=1)
    if direction == 2:
        return jnp.flip(img, axis=0)
    return jnp.flip(img, axis=(0, 1))


def _skew(a):
    """(4, H, W, B, C) -> (4, H, W+H-1, B, C) with out[:, y, y+x] = a[:, y, x],
    zeros elsewhere (pad + reshape trick)."""
    d, h, w, b, c = a.shape
    wp = w + h - 1
    a = jnp.pad(a, ((0, 0), (0, 0), (0, h), (0, 0), (0, 0)))
    return a.reshape(d, h * (w + h), b, c)[:, :h * wp].reshape(d, h, wp, b, c)


def _unskew(a, width):
    """(4, H, W+H-1, B, C) -> (4, H, W, B, C) with out[:, y, x] = a[:, y, y+x]."""
    d, h, wp, b, c = a.shape
    a = a.reshape(d, h * wp, b, c)
    a = jnp.pad(a, ((0, 0), (0, h), (0, 0), (0, 0)))
    return a.reshape(d, h, wp + 1, b, c)[:, :, :width]


# ----------------------------------------------------------------------------
# Forward: projection preamble + single fused wavefront pallas_call + epilogue.
# ----------------------------------------------------------------------------
@functools.partial(jax.jit, static_argnames=("out_channels",
                                             "num_direction_blocks"))
def mdlstm_forward(x_nchw, w_all, u0_all, u1_all, b_all, *, out_channels,
                   num_direction_blocks=1):
    """x_nchw: (B, Cin, H, W) f32. Returns (h_mean, c_mean), each (B, O, H, W).

    num_direction_blocks: 1 = all 4 directions fused in one scan (best for
    single-TensorCore v5e/v6e); 2 = two directions per grid step on a
    "parallel" grid axis (megacore split for v7x). Must divide 4.
    """
    B, Cin, H, W = x_nchw.shape
    O = out_channels
    G = num_direction_blocks
    if 4 % G != 0:
        raise ValueError("num_direction_blocks must divide 4")
    D = 4 // G                       # directions handled per grid step
    Wp = W + H - 1                   # number of anti-diagonals
    HB = H * B                       # wavefront rows per direction
    pad = ((B + 7) // 8) * 8         # permanently-zero top-boundary rows

    # NCHW -> (H, W, B, Cin); pre-flip per scan direction and stack.
    x_hw = jnp.transpose(x_nchw, (2, 3, 0, 1))
    x_dirs = jnp.stack([_flip_hw(x_hw, d) for d in range(4)], axis=0)

    # Hoisted (non-recurrent) input projection: one batched matmul for the
    # whole image; it never sits on the serial scan's critical path.
    gx = jnp.einsum('dhwbc,dcg->dhwbg', x_dirs, w_all) + b_all[:, None, None]
    # Skew so each anti-diagonal is one contiguous slab, then reorder to the
    # kernel layout (diagonal, direction, y*B+b, 5*O).
    gx_k = jnp.transpose(_skew(gx), (2, 0, 1, 3, 4)).reshape(Wp, 4, HB, 5 * O)

    # Fused recurrent weights [U0; U1]: (4, 2*O, 5*O).
    u_cat = jnp.concatenate([u0_all, u1_all], axis=1)

    grid_spec = pltpu.PrefetchScalarGridSpec(
        num_scalar_prefetch=0,
        grid=(G,),
        in_specs=[
            pl.BlockSpec((Wp, D, HB, 5 * O), lambda g: (0, g, 0, 0)),
            pl.BlockSpec((D, 2 * O, 5 * O), lambda g: (g, 0, 0)),
        ],
        out_specs=[
            pl.BlockSpec((Wp, D, HB, O), lambda g: (0, g, 0, 0)),
            pl.BlockSpec((Wp, D, HB, O), lambda g: (0, g, 0, 0)),
        ],
        scratch_shapes=[
            pltpu.VMEM((D, pad + HB, O), jnp.float32),   # h wavefront buffer
            pltpu.VMEM((D, pad + HB, O), jnp.float32),   # c wavefront buffer
        ],
    )

    h_sk, c_sk = pl.pallas_call(
        functools.partial(_mdlstm_wavefront_kernel, batch=B, pad=pad),
        out_shape=(jax.ShapeDtypeStruct((Wp, 4, HB, O), jnp.float32),
                   jax.ShapeDtypeStruct((Wp, 4, HB, O), jnp.float32)),
        grid_spec=grid_spec,
        compiler_params=pltpu.CompilerParams(
            dimension_semantics=("parallel",)),
    )(gx_k, u_cat)

    # Kernel layout -> (4, H, W, B, O): un-skew, un-flip, average directions.
    def unpack(s):
        s = jnp.transpose(s.reshape(Wp, 4, H, B, O), (1, 2, 0, 3, 4))
        return _unskew(s, W)

    h_dirs, c_dirs = unpack(h_sk), unpack(c_sk)
    h_mean = sum(_flip_hw(h_dirs[d], d) for d in range(4)) * 0.25
    c_mean = sum(_flip_hw(c_dirs[d], d) for d in range(4)) * 0.25

    # (H, W, B, O) -> (B, O, H, W)  (PyTorch output convention).
    return (jnp.transpose(h_mean, (2, 3, 0, 1)),
            jnp.transpose(c_mean, (2, 3, 0, 1)))


# ----------------------------------------------------------------------------
# Deterministic parameter init (xavier-uniform, zero bias) for 4 directions.
# ----------------------------------------------------------------------------
def init_params(key, in_channels, out_channels):
    O = out_channels
    ws, u0s, u1s, bs = [], [], [], []
    for _ in range(4):
        kw, ku0, ku1, key = jax.random.split(key, 4)
        bound_w = np.sqrt(6.0 / (in_channels + 5 * O))
        bound_u = np.sqrt(6.0 / (O + 5 * O))
        ws.append(jax.random.uniform(kw, (in_channels, 5 * O), jnp.float32,
                                     -bound_w, bound_w))
        u0s.append(jax.random.uniform(ku0, (O, 5 * O), jnp.float32,
                                      -bound_u, bound_u))
        u1s.append(jax.random.uniform(ku1, (O, 5 * O), jnp.float32,
                                      -bound_u, bound_u))
        bs.append(jnp.zeros((1, 5 * O), jnp.float32))
    return (jnp.stack(ws), jnp.stack(u0s), jnp.stack(u1s), jnp.stack(bs))


# ----------------------------------------------------------------------------
# Pure numpy reference (mirrors the PyTorch module) for verification.
# ----------------------------------------------------------------------------
def _ref_mdlstm(x_nchw, w_all, u0_all, u1_all, b_all, out_channels):
    x = np.asarray(x_nchw, np.float32)
    B, C, H, W = x.shape
    O = out_channels

    def flip(img, d):  # NCHW flips like the torch module
        if d == 0:
            return img
        if d == 1:
            return img[:, :, :, ::-1]
        if d == 2:
            return img[:, :, ::-1, :]
        return img[:, :, ::-1, ::-1]

    def sig(z):
        return 1.0 / (1.0 + np.exp(-z))

    hs_all, cs_all = [], []
    for d in range(4):
        w = np.asarray(w_all[d]); u0 = np.asarray(u0_all[d])
        u1 = np.asarray(u1_all[d]); b = np.asarray(b_all[d])
        xo = flip(x, d)
        h_map = np.zeros((B, O, H, W), np.float32)
        c_map = np.zeros((B, O, H, W), np.float32)
        for y in range(H):
            for xw in range(W):
                xt = xo[:, :, y, xw]
                h0 = h_map[:, :, y - 1, xw] if y > 0 else np.zeros((B, O), np.float32)
                c0 = c_map[:, :, y - 1, xw] if y > 0 else np.zeros((B, O), np.float32)
                h1 = h_map[:, :, y, xw - 1] if xw > 0 else np.zeros((B, O), np.float32)
                c1 = c_map[:, :, y, xw - 1] if xw > 0 else np.zeros((B, O), np.float32)
                gates = xt @ w + h0 @ u0 + h1 @ u1 + b
                it, ft, gt, ot, lt = np.split(gates, 5, axis=1)
                it, ft, ot, lt = sig(it), sig(ft), sig(ot), sig(lt)
                gt = np.tanh(gt)
                ct = ft * (lt * c0 + (1.0 - lt) * c1) + it * gt
                ht = ot * np.tanh(ct)
                h_map[:, :, y, xw] = ht
                c_map[:, :, y, xw] = ct
        hs_all.append(flip(h_map, d))
        cs_all.append(flip(c_map, d))
    return (np.mean(np.stack(hs_all, 1), 1), np.mean(np.stack(cs_all, 1), 1))


if __name__ == "__main__":
    B, Cin, H, W, O = 2, 4, 16, 16, 32

    key = jax.random.PRNGKey(0)
    kx, kp = jax.random.split(key)
    x = jax.random.normal(kx, (B, Cin, H, W), jnp.float32)
    w_all, u0_all, u1_all, b_all = init_params(kp, Cin, O)

    h_mean, c_mean = mdlstm_forward(x, w_all, u0_all, u1_all, b_all,
                                    out_channels=O)
    h_mean = jax.block_until_ready(h_mean)
    c_mean = jax.block_until_ready(c_mean)

    assert h_mean.shape == (B, O, H, W) and c_mean.shape == (B, O, H, W)

    h_ref, c_ref = _ref_mdlstm(x, w_all, u0_all, u1_all, b_all, O)
    # Default (single-pass) MXU precision in the recurrent matmul -> slightly
    # looser tolerance than a pure-f32 comparison.
    np.testing.assert_allclose(np.asarray(h_mean), h_ref, rtol=2e-2, atol=5e-3)
    np.testing.assert_allclose(np.asarray(c_mean), c_ref, rtol=2e-2, atol=5e-3)

    print("KERNEL_OK")
</pallas_src>

<mosaic_0001>
module attributes {stable_mosaic.version = 11 : i64} {
  func.func @_mdlstm_wavefront_kernel(%arg0: i32, %arg1: memref<31x4x32x160xf32, #tpu.memory_space<vmem>>, %arg2: memref<4x64x160xf32, #tpu.memory_space<vmem>>, %arg3: memref<31x4x32x32xf32, #tpu.memory_space<vmem>>, %arg4: memref<31x4x32x32xf32, #tpu.memory_space<vmem>>, %arg5: memref<4x40x32xf32, #tpu.memory_space<vmem>>, %arg6: memref<4x40x32xf32, #tpu.memory_space<vmem>>) attributes {dimension_semantics = [#tpu.dimension_semantics<parallel>], iteration_bounds = array<i64: 1>, scalar_prefetch = 0 : i64, scratch_operands = 2 : i64, tpu.core_type = #tpu.core_type<tc>, window_params = [{transform_indices = @transform_0, window_bounds = array<i64: 31, 4, 32, 160>}, {transform_indices = @transform_1, window_bounds = array<i64: 4, 64, 160>}, {transform_indices = @transform_2, window_bounds = array<i64: 31, 4, 32, 32>}, {transform_indices = @transform_3, window_bounds = array<i64: 31, 4, 32, 32>}]} {
    %cst = arith.constant 0.000000e+00 : f32
    %0 = vector.broadcast %cst : f32 to vector<4x40x32xf32>
    %c0 = arith.constant 0 : index
    %c0_0 = arith.constant 0 : index
    %c0_1 = arith.constant 0 : index
    %1 = vector.load %arg5[%c0, %c0_0, %c0_1] : memref<4x40x32xf32, #tpu.memory_space<vmem>>, vector<4x40x32xf32>
    tpu.vector_store %arg5[%c0, %c0_0, %c0_1], %0 {strides = array<i32>} : memref<4x40x32xf32, #tpu.memory_space<vmem>>, vector<4x40x32xf32>,
    %cst_2 = arith.constant 0.000000e+00 : f32
    %2 = vector.broadcast %cst_2 : f32 to vector<4x40x32xf32>
    %c0_3 = arith.constant 0 : index
    %c0_4 = arith.constant 0 : index
    %c0_5 = arith.constant 0 : index
    %3 = vector.load %arg6[%c0_3, %c0_4, %c0_5] : memref<4x40x32xf32, #tpu.memory_space<vmem>>, vector<4x40x32xf32>
    tpu.vector_store %arg6[%c0_3, %c0_4, %c0_5], %2 {strides = array<i32>} : memref<4x40x32xf32, #tpu.memory_space<vmem>>, vector<4x40x32xf32>,
    %c0_i32 = arith.constant 0 : i32
    %c31_i32 = arith.constant 31 : i32
    %4 = arith.addi %c0_i32, %c31_i32 : i32
    %c1_i32 = arith.constant 1 : i32
    scf.for %arg7 = %c0_i32 to %4 step %c1_i32  : i32 {
      %c0_7 = arith.constant 0 : index
      %c8 = arith.constant 8 : index
      %c0_8 = arith.constant 0 : index
      %5 = vector.load %arg5[%c0_7, %c8, %c0_8] : memref<4x40x32xf32, #tpu.memory_space<vmem>>, vector<4x32x32xf32>
      %c0_9 = arith.constant 0 : index
      %c8_10 = arith.constant 8 : index
      %c0_11 = arith.constant 0 : index
      %6 = vector.load %arg6[%c0_9, %c8_10, %c0_11] : memref<4x40x32xf32, #tpu.memory_space<vmem>>, vector<4x32x32xf32>
      %c0_12 = arith.constant 0 : index
      %c6 = arith.constant 6 : index
      %c0_13 = arith.constant 0 : index
      %7 = vector.load %arg5[%c0_12, %c6, %c0_13] : memref<4x40x32xf32, #tpu.memory_space<vmem>>, vector<4x32x32xf32>
      %c0_14 = arith.constant 0 : index
      %c6_15 = arith.constant 6 : index
      %c0_16 = arith.constant 0 : index
      %8 = vector.load %arg6[%c0_14, %c6_15, %c0_16] : memref<4x40x32xf32, #tpu.memory_space<vmem>>, vector<4x32x32xf32>
      %9 = tpu.concatenate %7, %5 in 2 : vector<4x32x32xf32>, vector<4x32x32xf32> -> vector<4x32x64xf32>
      %10 = arith.index_cast %arg7 : i32 to index
      %c0_17 = arith.constant 0 : index
      %c0_18 = arith.constant 0 : index
      %c0_19 = arith.constant 0 : index
      %11 = vector.load %arg1[%10, %c0_17, %c0_18, %c0_19] : memref<31x4x32x160xf32, #tpu.memory_space<vmem>>, vector<1x4x32x160xf32>
      %12 = vector.shape_cast %11 : vector<1x4x32x160xf32> to vector<4x32x160xf32>
      %c0_20 = arith.constant 0 : index
      %c0_21 = arith.constant 0 : index
      %c0_22 = arith.constant 0 : index
      %13 = vector.load %arg2[%c0_20, %c0_21, %c0_22] : memref<4x64x160xf32, #tpu.memory_space<vmem>>, vector<4x64x160xf32>
      "tpu.trace_start"() <{level = 10 : i32, message = "dnk,dko->dno"}> : () -> ()
      %cst_23 = arith.constant dense<0.000000e+00> : vector<4x32x160xf32>
      %14 = tpu.matmul %9, %13, %cst_23 {dimension_numbers = #tpu.dot_dimension_numbers<[2], [1], [1], [2], [0, 0, 0, 1, 1, 2], [0], [0]>} : vector<4x32x64xf32>, vector<4x64x160xf32>, vector<4x32x160xf32> -> vector<4x32x160xf32>
      "tpu.trace_stop"() : () -> ()
      %15 = arith.addf %12, %14 : vector<4x32x160xf32>
      %16 = arith.negf %15 : vector<4x32x160xf32>
      %17 = math.exp %16 : vector<4x32x160xf32>
      %cst_24 = arith.constant 1.000000e+00 : f32
      %18 = vector.broadcast %cst_24 : f32 to vector<4x32x160xf32>
      %19 = arith.addf %18, %17 : vector<4x32x160xf32>
      %20 = arith.divf %18, %19 : vector<4x32x160xf32>
      %21 = vector.extract_strided_slice %20 {offsets = [0, 0, 0], sizes = [4, 32, 32], strides = [1, 1, 1]} : vector<4x32x160xf32> to vector<4x32x32xf32>
      %22 = vector.extract_strided_slice %20 {offsets = [0, 0, 32], sizes = [4, 32, 32], strides = [1, 1, 1]} : vector<4x32x160xf32> to vector<4x32x32xf32>
      %23 = vector.extract_strided_slice %20 {offsets = [0, 0, 96], sizes = [4, 32, 32], strides = [1, 1, 1]} : vector<4x32x160xf32> to vector<4x32x32xf32>
      %24 = vector.extract_strided_slice %20 {offsets = [0, 0, 128], sizes = [4, 32, 32], strides = [1, 1, 1]} : vector<4x32x160xf32> to vector<4x32x32xf32>
      %25 = vector.extract_strided_slice %15 {offsets = [0, 0, 64], sizes = [4, 32, 32], strides = [1, 1, 1]} : vector<4x32x160xf32> to vector<4x32x32xf32>
      %26 = math.tanh %25 : vector<4x32x32xf32>
      %27 = arith.mulf %24, %8 : vector<4x32x32xf32>
      %cst_25 = arith.constant 1.000000e+00 : f32
      %28 = vector.broadcast %cst_25 : f32 to vector<4x32x32xf32>
      %29 = arith.subf %28, %24 : vector<4x32x32xf32>
      %30 = arith.mulf %29, %6 : vector<4x32x32xf32>
      %31 = arith.addf %27, %30 : vector<4x32x32xf32>
      %32 = arith.mulf %22, %31 : vector<4x32x32xf32>
      %33 = arith.mulf %21, %26 : vector<4x32x32xf32>
      %34 = arith.addf %32, %33 : vector<4x32x32xf32>
      %35 = math.tanh %34 : vector<4x32x32xf32>
      %36 = arith.mulf %23, %35 : vector<4x32x32xf32>
      %37 = tpu.iota {dimensions = array<i32: 1>} : vector<4x32x32xi32>
      %c1_i32_26 = arith.constant 1 : i32
      %38 = arith.addi %arg7, %c1_i32_26 : i32
      %c2_i32 = arith.constant 2 : i32
      %39 = arith.muli %38, %c2_i32 : i32
      %40 = vector.broadcast %39 : i32 to vector<4x32x32xi32>
      %41 = arith.cmpi slt, %37, %40 : vector<4x32x32xi32>
      %cst_27 = arith.constant 0.000000e+00 : f32
      %42 = vector.broadcast %cst_27 : f32 to vector<4x32x32xf32>
      %43 = arith.select %41, %36, %42 : vector<4x32x32xi1>, vector<4x32x32xf32>
      %cst_28 = arith.constant 0.000000e+00 : f32
      %44 = vector.broadcast %cst_28 : f32 to vector<4x32x32xf32>
      %45 = arith.select %41, %34, %44 : vector<4x32x32xi1>, vector<4x32x32xf32>
      %c0_29 = arith.constant 0 : index
      %c8_30 = arith.constant 8 : index
      %c0_31 = arith.constant 0 : index
      %46 = vector.load %arg5[%c0_29, %c8_30, %c0_31] : memref<4x40x32xf32, #tpu.memory_space<vmem>>, vector<4x32x32xf32>
      tpu.vector_store %arg5[%c0_29, %c8_30, %c0_31], %43 {strides = array<i32>} : memref<4x40x32xf32, #tpu.memory_space<vmem>>, vector<4x32x32xf32>,
      %c0_32 = arith.constant 0 : index
      %c8_33 = arith.constant 8 : index
      %c0_34 = arith.constant 0 : index
      %47 = vector.load %arg6[%c0_32, %c8_33, %c0_34] : memref<4x40x32xf32, #tpu.memory_space<vmem>>, vector<4x32x32xf32>
      tpu.vector_store %arg6[%c0_32, %c8_33, %c0_34], %45 {strides = array<i32>} : memref<4x40x32xf32, #tpu.memory_space<vmem>>, vector<4x32x32xf32>,
      %48 = arith.index_cast %arg7 : i32 to index
      %c0_35 = arith.constant 0 : index
      %c0_36 = arith.constant 0 : index
      %c0_37 = arith.constant 0 : index
      %49 = vector.load %arg3[%48, %c0_35, %c0_36, %c0_37] : memref<31x4x32x32xf32, #tpu.memory_space<vmem>>, vector<1x4x32x32xf32>
      %50 = vector.shape_cast %49 : vector<1x4x32x32xf32> to vector<4x32x32xf32>
      %51 = vector.shape_cast %43 : vector<4x32x32xf32> to vector<1x4x32x32xf32>
      tpu.vector_store %arg3[%48, %c0_35, %c0_36, %c0_37], %51 {strides = array<i32>} : memref<31x4x32x32xf32, #tpu.memory_space<vmem>>, vector<1x4x32x32xf32>,
      %52 = arith.index_cast %arg7 : i32 to index
      %c0_38 = arith.constant 0 : index
      %c0_39 = arith.constant 0 : index
      %c0_40 = arith.constant 0 : index
      %53 = vector.load %arg4[%52, %c0_38, %c0_39, %c0_40] : memref<31x4x32x32xf32, #tpu.memory_space<vmem>>, vector<1x4x32x32xf32>
      %54 = vector.shape_cast %53 : vector<1x4x32x32xf32> to vector<4x32x32xf32>
      %55 = vector.shape_cast %45 : vector<4x32x32xf32> to vector<1x4x32x32xf32>
      tpu.vector_store %arg4[%52, %c0_38, %c0_39, %c0_40], %55 {strides = array<i32>} : memref<31x4x32x32xf32, #tpu.memory_space<vmem>>, vector<1x4x32x32xf32>,
    }
    %c31_i32_6 = arith.constant 31 : i32
    return
  }
  func.func @transform_0(%arg0: i32) -> (i32, i32, i32, i32) {
    %c0_i32 = arith.constant 0 : i32
    %c0_i32_0 = arith.constant 0 : i32
    %c0_i32_1 = arith.constant 0 : i32
    %c0_i32_2 = arith.constant 0 : i32
    return %c0_i32, %arg0, %c0_i32_0, %c0_i32_1 : i32, i32, i32, i32
  }
  func.func @transform_1(%arg0: i32) -> (i32, i32, i32) {
    %c0_i32 = arith.constant 0 : i32
    %c0_i32_0 = arith.constant 0 : i32
    %c0_i32_1 = arith.constant 0 : i32
    return %arg0, %c0_i32, %c0_i32_0 : i32, i32, i32
  }
  func.func @transform_2(%arg0: i32) -> (i32, i32, i32, i32) {
    %c0_i32 = arith.constant 0 : i32
    %c0_i32_0 = arith.constant 0 : i32
    %c0_i32_1 = arith.constant 0 : i32
    %c0_i32_2 = arith.constant 0 : i32
    return %c0_i32, %arg0, %c0_i32_0, %c0_i32_1 : i32, i32, i32, i32
  }
  func.func @transform_3(%arg0: i32) -> (i32, i32, i32, i32) {
    %c0_i32 = arith.constant 0 : i32
    %c0_i32_0 = arith.constant 0 : i32
    %c0_i32_1 = arith.constant 0 : i32
    %c0_i32_2 = arith.constant 0 : i32
    return %c0_i32, %arg0, %c0_i32_0, %c0_i32_1 : i32, i32, i32, i32
  }
}

</mosaic_0001>

<bundles_post_ra>
// kernel: mdlstm_forward.1
= control target key start
LH: loop header
LB: loop body
LE: loop exit
PB: predicated region body
PF: predicated region fallthrough
CT: control target
= control target key end

     0   :  { %vm13_vm0 = vcmask 261120   ;;  %v2181_v0 = vmov 0.0   ;;  %s2245_s12 = smov 0   ;;  %s3625_s0 = inlined_call_operand.vmem [shape: f32[31,4,32,160], index: 0, kind: input, shape index: {}]   ;;  %s3626_s1 = inlined_call_operand.vmem [shape: f32[4,64,160], index: 1, kind: input, shape index: {}]   ;;  %s3627_s2 = inlined_call_operand.vmem [shape: f32[31,4,32,32], index: 2, kind: output, shape index: {0}]   ;;  %s3628_s3 = inlined_call_operand.vmem [shape: f32[31,4,32,32], index: 3, kind: output, shape index: {1}]  }
   0x1   :  { %14 = vst.msk [vmem:[#allocation2] sm:$0xff] %vm13_vm0, %v2181_v0 }
   0x2   :  { %15 = vst.msk [vmem:[#allocation2 + $0x8] sm:$0xff] %vm13_vm0, %v2181_v0 }
   0x3   :  { %16 = vst.msk [vmem:[#allocation2 + $0x10] sm:$0xff] %vm13_vm0, %v2181_v0 }
   0x4   :  { %17 = vst.msk [vmem:[#allocation2 + $0x18] sm:$0xff] %vm13_vm0, %v2181_v0 }
   0x5   :  { %18 = vst.msk [vmem:[#allocation2 + $0x20] sm:$0xff] %vm13_vm0, %v2181_v0 }
   0x6   :  { %19 = vst.msk [vmem:[#allocation2 + $0x28] sm:$0xff] %vm13_vm0, %v2181_v0 }
   0x7   :  { %20 = vst.msk [vmem:[#allocation2 + $0x30] sm:$0xff] %vm13_vm0, %v2181_v0 }
   0x8   :  { %21 = vst.msk [vmem:[#allocation2 + $0x38] sm:$0xff] %vm13_vm0, %v2181_v0 }
   0x9   :  { %22 = vst.msk [vmem:[#allocation2 + $0x40] sm:$0xff] %vm13_vm0, %v2181_v0 }
   0xa   :  { %23 = vst.msk [vmem:[#allocation2 + $0x48] sm:$0xff] %vm13_vm0, %v2181_v0 }
   0xb   :  { %24 = vst.msk [vmem:[#allocation2 + $0x50] sm:$0xff] %vm13_vm0, %v2181_v0 }
   0xc   :  { %25 = vst.msk [vmem:[#allocation2 + $0x58] sm:$0xff] %vm13_vm0, %v2181_v0 }
   0xd   :  { %26 = vst.msk [vmem:[#allocation2 + $0x60] sm:$0xff] %vm13_vm0, %v2181_v0 }
   0xe   :  { %27 = vst.msk [vmem:[#allocation2 + $0x68] sm:$0xff] %vm13_vm0, %v2181_v0 }
   0xf   :  { %28 = vst.msk [vmem:[#allocation2 + $0x70] sm:$0xff] %vm13_vm0, %v2181_v0 }
  0x10   :  { %29 = vst.msk [vmem:[#allocation2 + $0x78] sm:$0xff] %vm13_vm0, %v2181_v0 }
  0x11   :  { %30 = vst.msk [vmem:[#allocation2 + $0x80] sm:$0xff] %vm13_vm0, %v2181_v0 }
  0x12   :  { %31 = vst.msk [vmem:[#allocation2 + $0x88] sm:$0xff] %vm13_vm0, %v2181_v0 }
  0x13   :  { %32 = vst.msk [vmem:[#allocation2 + $0x90] sm:$0xff] %vm13_vm0, %v2181_v0 }
  0x14   :  { %33 = vst.msk [vmem:[#allocation2 + $0x98] sm:$0xff] %vm13_vm0, %v2181_v0 }
  0x15   :  { %34 = vst.msk [vmem:[#allocation3] sm:$0xff] %vm13_vm0, %v2181_v0 }
  0x16   :  { %35 = vst.msk [vmem:[#allocation3 + $0x8] sm:$0xff] %vm13_vm0, %v2181_v0 }
  0x17   :  { %36 = vst.msk [vmem:[#allocation3 + $0x10] sm:$0xff] %vm13_vm0, %v2181_v0 }
  0x18   :  { %37 = vst.msk [vmem:[#allocation3 + $0x18] sm:$0xff] %vm13_vm0, %v2181_v0 }
  0x19   :  { %38 = vst.msk [vmem:[#allocation3 + $0x20] sm:$0xff] %vm13_vm0, %v2181_v0 }
  0x1a   :  { %39 = vst.msk [vmem:[#allocation3 + $0x28] sm:$0xff] %vm13_vm0, %v2181_v0 }
  0x1b   :  { %40 = vst.msk [vmem:[#allocation3 + $0x30] sm:$0xff] %vm13_vm0, %v2181_v0 }
  0x1c   :  { %41 = vst.msk [vmem:[#allocation3 + $0x38] sm:$0xff] %vm13_vm0, %v2181_v0 }
  0x1d   :  { %42 = vst.msk [vmem:[#allocation3 + $0x40] sm:$0xff] %vm13_vm0, %v2181_v0 }
  0x1e   :  { %43 = vst.msk [vmem:[#allocation3 + $0x48] sm:$0xff] %vm13_vm0, %v2181_v0 }
  0x1f   :  { %44 = vst.msk [vmem:[#allocation3 + $0x50] sm:$0xff] %vm13_vm0, %v2181_v0 }
  0x20   :  { %45 = vst.msk [vmem:[#allocation3 + $0x58] sm:$0xff] %vm13_vm0, %v2181_v0 }
  0x21   :  { %46 = vst.msk [vmem:[#allocation3 + $0x60] sm:$0xff] %vm13_vm0, %v2181_v0 }
  0x22   :  { %47 = vst.msk [vmem:[#allocation3 + $0x68] sm:$0xff] %vm13_vm0, %v2181_v0 }
  0x23   :  { %48 = vst.msk [vmem:[#allocation3 + $0x70] sm:$0xff] %vm13_vm0, %v2181_v0 }
  0x24   :  { %49 = vst.msk [vmem:[#allocation3 + $0x78] sm:$0xff] %vm13_vm0, %v2181_v0 }
  0x25   :  { %50 = vst.msk [vmem:[#allocation3 + $0x80] sm:$0xff] %vm13_vm0, %v2181_v0 }
  0x26   :  { %51 = vst.msk [vmem:[#allocation3 + $0x88] sm:$0xff] %vm13_vm0, %v2181_v0 }
  0x27   :  { %52 = vst.msk [vmem:[#allocation3 + $0x90] sm:$0xff] %vm13_vm0, %v2181_v0 }
  0x28   :  { %53 = vst.msk [vmem:[#allocation3 + $0x98] sm:$0xff] %vm13_vm0, %v2181_v0 }
  0x29 LB: > { %v64_v1 = vld [vmem:[#allocation2 + $0x30] sm:$0xff]  ;;  %v65_v2 = vld [vmem:[#allocation2 + $0x38] sm:$0xff]  ;;  %s2182_s13 = smov 32   ;;  %v66_v3 = vld [vmem:[#allocation2 + $0x40] sm:$0xff]  ;;  %vm303_vm1 = vcmask 523264   ;;  %s1966_s17 = sshll.u32 %s2179_s12, 8  ;;  %s2179_s12 = sphi %s2245_s12, %s59_s12  }
  0x2a   : > { %148 = vrot.lane.b32.xlu0 %v64_v1, %s2182_s13  ;;  %150 = vrot.lane.b32.xlu1 %v65_v2, %s2182_s13  ;;  %v60_v4 = vld [vmem:[#allocation2 + $0x8] sm:$0xff]  ;;  %v61_v5 = vld [vmem:[#allocation2 + $0x10] sm:$0xff]  ;;  %v62_v6 = vld [vmem:[#allocation2 + $0x18] sm:$0xff]  ;;  %s2510_s20 = scalar_lea.vmem %s3625_s0, %s1966_s17  ;;  %s2183_s21 = smov 64  }
  0x2b   : > { %152 = vrot.lane.b32.xlu2 %v66_v3, %s2182_s13  ;;  %v269_v7 = vld [vmem:[%s3626_s1 + $0xf0] sm:$0xff]  ;;  %v270_v8 = vld [vmem:[%s3626_s1 + $0xf8] sm:$0xff]  ;;  %v267_v9 = vld [vmem:[%s3626_s1 + $0xe0] sm:$0xff]  ;;  %s1967_s22 = sshll.u32 %s2179_s12, 1  ;;  %s2184_s24 = smov 96  }
  0x2c   : > { %394 = vmatpush.msra.mxu2 %v269_v7  ;;  %v268_v10 = vld [vmem:[%s3626_s1 + $0xe8] sm:$0xff]  ;;  %423 = vmatpush.msra.mxu3 %v270_v8  ;;  %v265_v11 = vld [vmem:[%s3626_s1 + $0xd0] sm:$0xff]  ;;  %v266_v12 = vld [vmem:[%s3626_s1 + $0xd8] sm:$0xff]  ;;  %s1968_s23 = sadd.s32 2, %s1967_s22  ;;  %s1965_s25 = sshll.u32 %s2179_s12, 7 }
  0x2d   : > { %v253_v13 = vld [vmem:[%s3626_s1 + $0x70] sm:$0xff]  ;;  %v254_v14 = vld [vmem:[%s3626_s1 + $0x78] sm:$0xff]  ;;  %v263_v15 = vld [vmem:[%s3626_s1 + $0xc0] sm:$0xff]  ;;  %s3445_s28 = scalar_lea.vmem %s3628_s3, %s1965_s25  ;;  %s3559_s4 = scalar_lea.vmem %s3627_s2, %s1965_s25 }
  0x2e   : > { %395 = vmatpush.msra.mxu2 %v267_v9  ;;  %424 = vmatpush.msra.mxu3 %v268_v10  ;;  %v251_v16 = vld [vmem:[%s3626_s1 + $0x60] sm:$0xff]  ;;  %v67_v17 = vld [vmem:[#allocation2 + $0x48] sm:$0xff]  ;;  %v261_v21 = vld [vmem:[%s3626_s1 + $0xb0] sm:$0xff]  ;;  %s59_s12 = sadd.s32 1, %s2179_s12  }
  0x2f   : > { %324 = vmatpush.msra.mxu0 %v253_v13  ;;  %v63_v18 = vld [vmem:[#allocation2 + $0x20] sm:$0xff]  ;;  %353 = vmatpush.msra.mxu1 %v254_v14  ;;  %v252_v19 = vld [vmem:[%s3626_s1 + $0x68] sm:$0xff]  ;;  %v249_v23 = vld [vmem:[%s3626_s1 + $0x50] sm:$0xff]  ;;  %p56_p0 = scmp.ge.s32.totalorder %s59_s12, 31  }
  0x30   : > { %396 = vmatpush.msra.mxu2 %v265_v11  ;;  %425 = vmatpush.msra.mxu3 %v266_v12  ;;  %v264_v20 = vld [vmem:[%s3626_s1 + $0xc8] sm:$0xff]  ;;  %v72_v22 = vld [vmem:[#allocation2 + $0x80] sm:$0xff]  ;;  %v262_v24 = vld [vmem:[%s3626_s1 + $0xb8] sm:$0xff] }
  0x31   : > { %325 = vmatpush.msra.mxu0 %v251_v16  ;;  %354 = vmatpush.msra.mxu1 %v252_v19  ;;  %v259_v25 = vld [vmem:[%s3626_s1 + $0xa0] sm:$0xff]  ;;  %v250_v26 = vld [vmem:[%s3626_s1 + $0x58] sm:$0xff]  ;;  %v260_v27 = vld [vmem:[%s3626_s1 + $0xa8] sm:$0xff] }
  0x32   : > { %140 = vrot.lane.b32.xlu0 %v60_v4, %s2182_s13  ;;  %142 = vrot.lane.b32.xlu1 %v61_v5, %s2182_s13  ;;  %v257_v28 = vld [vmem:[%s3626_s1 + $0x90] sm:$0xff]  ;;  %v258_v29 = vld [vmem:[%s3626_s1 + $0x98] sm:$0xff]  ;;  %v73_v30 = vld [vmem:[#allocation2 + $0x88] sm:$0xff] }
  0x33   : > { %144 = vrot.lane.b32.xlu2 %v62_v6, %s2182_s13  ;;  %397 = vmatpush.msra.mxu2 %v263_v15  ;;  %v68_v31 = vld [vmem:[#allocation2 + $0x58] sm:$0xff]  ;;  %v69_v32 = vld [vmem:[#allocation2 + $0x60] sm:$0xff]  ;;  %v74_v33 = vld [vmem:[#allocation2 + $0x90] sm:$0xff] }
  0x34   : > { %426 = vmatpush.msra.mxu3 %v264_v20  ;;  %326 = vmatpush.msra.mxu0 %v249_v23  ;;  %v70_v34 = vld [vmem:[#allocation2 + $0x68] sm:$0xff]  ;;  %v75_v35 = vld [vmem:[#allocation2 + $0x98] sm:$0xff]  ;;  %v71_v36 = vld [vmem:[#allocation2 + $0x70] sm:$0xff] }
  0x35   : > { %398 = vmatpush.msra.mxu2 %v261_v21  ;;  %355 = vmatpush.msra.mxu1 %v250_v26  ;;  %v247_v37 = vld [vmem:[%s3626_s1 + $0x40] sm:$0xff]  ;;  %v248_v38 = vld [vmem:[%s3626_s1 + $0x48] sm:$0xff]  ;;  %v245_v41 = vld [vmem:[%s3626_s1 + $0x30] sm:$0xff] }
  0x36   : > { %427 = vmatpush.msra.mxu3 %v262_v24  ;;  %v255_v39 = vld [vmem:[%s3626_s1 + $0x80] sm:$0xff]  ;;  %327 = vmatpush.msra.mxu0 %v247_v37  ;;  %v256_v40 = vld [vmem:[%s3626_s1 + $0x88] sm:$0xff]  ;;  %v246_v42 = vld [vmem:[%s3626_s1 + $0x38] sm:$0xff] }
  0x37   : > { %399 = vmatpush.msra.mxu2 %v259_v25  ;;  %356 = vmatpush.msra.mxu1 %v248_v38  ;;  %v243_v43 = vld [vmem:[%s3626_s1 + $0x20] sm:$0xff]  ;;  %v244_v44 = vld [vmem:[%s3626_s1 + $0x28] sm:$0xff]  ;;  %v241_v45 = vld [vmem:[%s3626_s1 + $0x10] sm:$0xff] }
  0x38   : > { %428 = vmatpush.msra.mxu3 %v260_v27  ;;  %328 = vmatpush.msra.mxu0 %v245_v41  ;;  %v242_v46 = vld [vmem:[%s3626_s1 + $0x18] sm:$0xff]  ;;  %v239_v47 = vld [vmem:[%s3626_s1] sm:$0xff]  ;;  %v240_v48 = vld [vmem:[%s3626_s1 + $0x8] sm:$0xff] }
  0x39   : > { %400 = vmatpush.msra.mxu2 %v257_v28  ;;  %357 = vmatpush.msra.mxu1 %v246_v42  ;;  %v302_v49 = vld [vmem:[%s3626_s1 + $0x1f8] sm:$0xff]  ;;  %v300_v50 = vld [vmem:[%s3626_s1 + $0x1e8] sm:$0xff]  ;;  %v285_v51 = vld [vmem:[%s3626_s1 + $0x170] sm:$0xff] }
  0x3a   : > { %154 = vrot.lane.b32.xlu0 %v67_v17, %s2182_s13  ;;  %146 = vrot.lane.b32.xlu1 %v63_v18, %s2182_s13  ;;  %v286_v52 = vld [vmem:[%s3626_s1 + $0x178] sm:$0xff]  ;;  %v301_v53 = vld [vmem:[%s3626_s1 + $0x1f0] sm:$0xff]  ;;  %v92_v20 = vld [vmem:[#allocation2 + $0x6] sm:$0xff] }
  0x3b   : > { %164 = vrot.lane.b32.xlu2 %v72_v22, %s2182_s13  ;;  %429 = vmatpush.msra.mxu3 %v258_v29  ;;  %v298_v54 = vld [vmem:[%s3626_s1 + $0x1d8] sm:$0xff]  ;;  %v299_v55 = vld [vmem:[%s3626_s1 + $0x1e0] sm:$0xff]  ;;  %v284_v57 = vld [vmem:[%s3626_s1 + $0x168] sm:$0xff] }
  0x3c   : > { %401 = vmatpush.msra.mxu2 %v255_v39  ;;  %329 = vmatpush.msra.mxu0 %v243_v43  ;;  %v283_v56 = vld [vmem:[%s3626_s1 + $0x160] sm:$0xff]  ;;  %v296_v58 = vld [vmem:[%s3626_s1 + $0x1c8] sm:$0xff]  ;;  %v297_v59 = vld [vmem:[%s3626_s1 + $0x1d0] sm:$0xff] }
  0x3d   : > { %430 = vmatpush.msra.mxu3 %v256_v40  ;;  %358 = vmatpush.msra.mxu1 %v244_v44  ;;  %v295_v60 = vld [vmem:[%s3626_s1 + $0x1c0] sm:$0xff]  ;;  %v281_v61 = vld [vmem:[%s3626_s1 + $0x150] sm:$0xff]  ;;  %v282_v62 = vld [vmem:[%s3626_s1 + $0x158] sm:$0xff] }
  0x3e   : > { %330 = vmatpush.msra.mxu0 %v241_v45  ;;  %534 = vmatpush.msrb.mxu2 %v301_v53  ;;  %v293_v63 = vld [vmem:[%s3626_s1 + $0x1b0] sm:$0xff]  ;;  %v294_v0 = vld [vmem:[%s3626_s1 + $0x1b8] sm:$0xff]  ;;  %v291_v1 = vld [vmem:[%s3626_s1 + $0x1a0] sm:$0xff] }
  0x3f   : > { %359 = vmatpush.msra.mxu1 %v242_v46  ;;  %563 = vmatpush.msrb.mxu3 %v302_v49  ;;  %v292_v2 = vld [vmem:[%s3626_s1 + $0x1a8] sm:$0xff]  ;;  %v279_v3 = vld [vmem:[%s3626_s1 + $0x140] sm:$0xff]  ;;  %v289_v6 = vld [vmem:[%s3626_s1 + $0x190] sm:$0xff] }
  0x40   : > { %331 = vmatpush.msra.mxu0 %v239_v47  ;;  %535 = vmatpush.msrb.mxu2 %v299_v55  ;;  %v280_v4 = vld [vmem:[%s3626_s1 + $0x148] sm:$0xff]  ;;  %v290_v7 = vld [vmem:[%s3626_s1 + $0x198] sm:$0xff]  ;;  %v287_v9 = vld [vmem:[%s3626_s1 + $0x180] sm:$0xff] }
  0x41   : > { %360 = vmatpush.msra.mxu1 %v240_v48  ;;  %564 = vmatpush.msrb.mxu3 %v300_v50  ;;  %v96_v5 = vld [vmem:[#allocation2 + $0x2e] sm:$0xff]  ;;  %v278_v14 = vld [vmem:[%s3626_s1 + $0x138] sm:$0xff]  ;;  %v275_v15 = vld [vmem:[%s3626_s1 + $0x120] sm:$0xff] }
  0x42   : > { %166 = vrot.lane.b32.xlu1 %v73_v30, %s2182_s13  ;;  %156 = vrot.lane.b32.xlu0 %v68_v31, %s2182_s13  ;;  %v288_v10 = vld [vmem:[%s3626_s1 + $0x188] sm:$0xff]  ;;  %v277_v13 = vld [vmem:[%s3626_s1 + $0x130] sm:$0xff]  ;;  %v98_v29 = vld [vmem:[#allocation2 + $0x3e] sm:$0xff] }
  0x43   : > { %158 = vrot.lane.b32.xlu2 %v69_v32, %s2182_s13  ;;  %464 = vmatpush.msrb.mxu0 %v285_v51  ;;  %v276_v16 = vld [vmem:[%s3626_s1 + $0x128] sm:$0xff]  ;;  %v97_v17 = vld [vmem:[#allocation2 + $0x36] sm:$0xff]  ;;  %v271_v25 = vld [vmem:[%s3626_s1 + $0x100] sm:$0xff] }
  0x44   : > { %493 = vmatpush.msrb.mxu1 %v286_v52  ;;  %565 = vmatpush.msrb.mxu3 %v298_v54  ;;  %v273_v18 = vld [vmem:[%s3626_s1 + $0x110] sm:$0xff]  ;;  %v274_v19 = vld [vmem:[%s3626_s1 + $0x118] sm:$0xff]  ;;  %v272_v26 = vld [vmem:[%s3626_s1 + $0x108] sm:$0xff] }
  0x45   : > { %465 = vmatpush.msrb.mxu0 %v283_v56  ;;  %536 = vmatpush.msrb.mxu2 %v297_v59  ;;  %v93_v27 = vld [vmem:[#allocation2 + $0xe] sm:$0xff]  ;;  %v95_v39 = vld [vmem:[#allocation2 + $0x1e] sm:$0xff]  ;;  %v100_v45 = vld [vmem:[#allocation2 + $0x56] sm:$0xff] }
  0x46   : > { %494 = vmatpush.msrb.mxu1 %v284_v57  ;;  %566 = vmatpush.msrb.mxu3 %v296_v58  ;;  %v104_v40 = vld [vmem:[#allocation2 + $0x7e] sm:$0xff]  ;;  %v105_v46 = vld [vmem:[#allocation2 + $0x86] sm:$0xff]  ;;  %v106_v52 = vld [vmem:[#allocation2 + $0x8e] sm:$0xff] }
  0x47   : > { %537 = vmatpush.msrb.mxu2 %v295_v60  ;;  %466 = vmatpush.msrb.mxu0 %v281_v61  ;;  %v101_v50 = vld [vmem:[#allocation2 + $0x5e] sm:$0xff]  ;;  %v102_v56 = vld [vmem:[#allocation2 + $0x66] sm:$0xff]  ;;  %v107_v58 = vld [vmem:[#allocation2 + $0x96] sm:$0xff] }
  0x48   : > { %495 = vmatpush.msrb.mxu1 %v282_v62  ;;  %567 = vmatpush.msrb.mxu3 %v294_v0  ;;  %v103_v62 = vld [vmem:[#allocation2 + $0x6e] sm:$0xff] }
  0x49   : > { %538 = vmatpush.msrb.mxu2 %v293_v63  ;;  %467 = vmatpush.msrb.mxu0 %v279_v3 }
  0x4a   : > { %168 = vrot.lane.b32.xlu0 %v74_v33, %s2182_s13  ;;  %160 = vrot.lane.b32.xlu1 %v70_v34, %s2182_s13  ;;  %v94_v33 = vld [vmem:[#allocation2 + $0x16] sm:$0xff]  ;;  %v99_v34 = vld [vmem:[#allocation2 + $0x46] sm:$0xff] }
  0x4b   : > { %170 = vrot.lane.b32.xlu2 %v75_v35, %s2182_s13  ;;  %496 = vmatpush.msrb.mxu1 %v280_v4 }
  0x4c   : > { %539 = vmatpush.msrb.mxu2 %v291_v1  ;;  %568 = vmatpush.msrb.mxu3 %v292_v2  ;;  %v215_v1 = vld [vmem:[%s2510_s20 + $0x40] sm:$0xff]  ;;  %v216_v2 = vld [vmem:[%s2510_s20 + $0x48] sm:$0xff] }
  0x4d   : > { %468 = vmatpush.msrb.mxu0 %v277_v13  ;;  %497 = vmatpush.msrb.mxu1 %v278_v14 }
  0x4e   : > { %540 = vmatpush.msrb.mxu2 %v289_v6  ;;  %569 = vmatpush.msrb.mxu3 %v290_v7  ;;  %v207_v7 = vld [vmem:[%s2510_s20] sm:$0xff] }
  0x4f   : > { %469 = vmatpush.msrb.mxu0 %v275_v15  ;;  %498 = vmatpush.msrb.mxu1 %v276_v16  ;;  %v217_v16 = vld [vmem:[%s2510_s20 + $0x50] sm:$0xff] }
  0x50   : > { %541 = vmatpush.msrb.mxu2 %v287_v9  ;;  %570 = vmatpush.msrb.mxu3 %v288_v10 }
  0x51   : > { %470 = vmatpush.msrb.mxu0 %v273_v18  ;;  %499 = vmatpush.msrb.mxu1 %v274_v19  ;;  %v209_v18 = vld [vmem:[%s2510_s20 + $0x10] sm:$0xff] }
  0x52   : > { %162 = vrot.lane.b32.xlu0 %v71_v36, %s2182_s13 }
  0x53   : > { %471 = vmatpush.msrb.mxu0 %v271_v25  ;;  %500 = vmatpush.msrb.mxu1 %v272_v26 }
  0x85   : > { %v153_v24 = vpop.permute.xlu2 %152 }
  0x86   : > { %v194_v31 = vsel %vm13_vm0, %v98_v29, %v153_v24  ;;  %v210_v24 = vld [vmem:[%s2510_s20 + $0x18] sm:$0xff] }
  0x8d   : > { %v145_v32 = vpop.permute.xlu2 %144 }
  0x8e   : > { %v190_v36 = vsel %vm13_vm0, %v94_v33, %v145_v32 }
  0x95   : > { %v165_v41 = vpop.permute.xlu2 %164 }
  0x96   : > { %v200_v43 = vsel %vm13_vm0, %v104_v40, %v165_v41 }
  0x9c   : > { %v149_v8 = vpop.permute.xlu0 %148  ;;  %v151_v12 = vpop.permute.xlu1 %150 }
  0x9d   : > { %v192_v11 = vsel %vm13_vm0, %v96_v5, %v149_v8  ;;  %v193_v21 = vsel %vm13_vm0, %v97_v17, %v151_v12  ;;  %v159_v51 = vpop.permute.xlu2 %158  ;;  %v208_v8 = vld [vmem:[%s2510_s20 + $0x8] sm:$0xff]  ;;  %v218_v17 = vld [vmem:[%s2510_s20 + $0x58] sm:$0xff] }
  0x9e   : > { %1908 = vmatmul.msk.f32.vlgmr.msra.gmra.mxu2 %vm303_vm1, %v192_v11  ;;  %1912 = vmatmul.msk.f32.vlgmr.msra.gmra.mxu3 %vm303_vm1, %v192_v11  ;;  %v197_v54 = vsel %vm13_vm0, %v101_v50, %v159_v51 }
  0xa4   : > { %v141_v22 = vpop.permute.xlu0 %140  ;;  %v143_v28 = vpop.permute.xlu1 %142 }
  0xa5   : > { %v188_v23 = vsel %vm13_vm0, %v92_v20, %v141_v22  ;;  %v189_v30 = vsel %vm13_vm0, %v93_v27, %v143_v28  ;;  %v171_v59 = vpop.permute.xlu2 %170 }
  0xa6   : > { %1900 = vmatmul.msk.f32.vlgmr.msra.gmra.mxu0 %vm303_vm1, %v188_v23  ;;  %1904 = vmatmul.msk.f32.vlgmr.msra.gmra.mxu1 %vm303_vm1, %v188_v23  ;;  %v203_v61 = vsel %vm13_vm0, %v107_v58, %v171_v59 }
  0xa7   : > { %1909 = vmatmul.msk.f32.gmra.mxu2 %vm303_vm1, %v193_v21  ;;  %1913 = vmatmul.msk.f32.gmra.mxu3 %vm303_vm1, %v193_v21 }
  0xac   : > { %v155_v35 = vpop.permute.xlu0 %154  ;;  %v147_v38 = vpop.permute.xlu1 %146 }
  0xad   : > { %v195_v37 = vsel %vm13_vm0, %v99_v34, %v155_v35  ;;  %v191_v42 = vsel %vm13_vm0, %v95_v39, %v147_v38 }
  0xae   : > { %1901 = vmatmul.msk.f32.gmra.mxu0 %vm303_vm1, %v189_v30  ;;  %1905 = vmatmul.msk.f32.gmra.mxu1 %vm303_vm1, %v189_v30 }
  0xaf   : > { %1910 = vmatmul.msk.f32.gmra.mxu2 %vm303_vm1, %v194_v31  ;;  %1914 = vmatmul.msk.f32.gmra.mxu3 %vm303_vm1, %v194_v31 }
  0xb4   : > { %v157_v44 = vpop.permute.xlu0 %156  ;;  %v167_v47 = vpop.permute.xlu1 %166 }
  0xb5   : > { %v196_v48 = vsel %vm13_vm0, %v100_v45, %v157_v44  ;;  %v201_v49 = vsel %vm13_vm0, %v105_v46, %v167_v47  ;;  %v211_v47 = vld [vmem:[%s2510_s20 + $0x20] sm:$0xff] }
  0xb6   : > { %1902 = vmatmul.msk.f32.gmra.mxu0 %vm303_vm1, %v190_v36  ;;  %1906 = vmatmul.msk.f32.gmra.mxu1 %vm303_vm1, %v190_v36  ;;  %v219_v36 = vld [vmem:[%s2510_s20 + $0x60] sm:$0xff] }
  0xb7   : > { %1911 = vmatmul.msk.f32.gmra.mxu2 %vm303_vm1, %v195_v37  ;;  %1915 = vmatmul.msk.f32.gmra.mxu3 %vm303_vm1, %v195_v37 }
  0xbc   : > { %v169_v53 = vpop.permute.xlu0 %168  ;;  %v161_v57 = vpop.permute.xlu1 %160 }
  0xbd   : > { %v202_v55 = vsel %vm13_vm0, %v106_v52, %v169_v53  ;;  %v198_v60 = vsel %vm13_vm0, %v102_v56, %v161_v57  ;;  %v212_v52 = vld [vmem:[%s2510_s20 + $0x28] sm:$0xff] }
  0xbe   : > { %1903 = vmatmul.msk.f32.gmra.mxu0 %vm303_vm1, %v191_v42  ;;  %1907 = vmatmul.msk.f32.gmra.mxu1 %vm303_vm1, %v191_v42  ;;  %v220_v42 = vld [vmem:[%s2510_s20 + $0x68] sm:$0xff] }
  0xbf   : > { %1924 = vmatmul.msk.f32.vlgmr.msrb.gmra.mxu2 %vm303_vm1, %v200_v43  ;;  %1928 = vmatmul.msk.f32.vlgmr.msrb.gmra.mxu3 %vm303_vm1, %v200_v43 }
  0xc4   : > { %v163_v63 = vpop.permute.xlu0 %162 }
  0xc5   : > { %v199_v0 = vsel %vm13_vm0, %v103_v62, %v163_v63 }
  0xc6   : > { %1916 = vmatmul.msk.f32.vlgmr.msrb.gmra.mxu0 %vm303_vm1, %v196_v48  ;;  %1920 = vmatmul.msk.f32.vlgmr.msrb.gmra.mxu1 %vm303_vm1, %v196_v48 }
  0xc7   : > { %1925 = vmatmul.msk.f32.gmra.mxu2 %vm303_vm1, %v201_v49  ;;  %1929 = vmatmul.msk.f32.gmra.mxu3 %vm303_vm1, %v201_v49 }
  0xce   : > { %1917 = vmatmul.msk.f32.gmra.mxu0 %vm303_vm1, %v197_v54  ;;  %1921 = vmatmul.msk.f32.gmra.mxu1 %vm303_vm1, %v197_v54 }
  0xcf   : > { %1926 = vmatmul.msk.f32.gmra.mxu2 %vm303_vm1, %v202_v55  ;;  %1930 = vmatmul.msk.f32.gmra.mxu3 %vm303_vm1, %v202_v55 }
  0xd6   : > { %1918 = vmatmul.msk.f32.gmra.mxu0 %vm303_vm1, %v198_v60  ;;  %1922 = vmatmul.msk.f32.gmra.mxu1 %vm303_vm1, %v198_v60 }
  0xd7   : > { %1931 = vmatmul.msk.f32.gmra.mxu3 %vm303_vm1, %v203_v61  ;;  %1927 = vmatmul.msk.f32.gmra.mxu2 %vm303_vm1, %v203_v61 }
  0xde   : > { %1919 = vmatmul.msk.f32.gmra.mxu0 %vm303_vm1, %v199_v0  ;;  %1923 = vmatmul.msk.f32.gmra.mxu1 %vm303_vm1, %v199_v0 }
 0x121   : > { %v403_v3 = vpop.f32.mrf.mxu2  ;;  %v432_v4 = vpop.f32.mrf.mxu3 }
 0x122   : > { %v592_v5 = vadd.f32 %v403_v3, %v215_v1  ;;  %v593_v6 = vadd.f32 %v432_v4, %v216_v2 }
 0x123   : > { %v333_v9 = vpop.f32.mrf.mxu0  ;;  %v362_v10 = vpop.f32.mrf.mxu1 }
 0x124   : > { %1981 = vtanh.f32 %v592_v5  ;;  %v1941_v11 = vmul.f32 -1.442695, %v593_v6  ;;  %v584_v12 = vadd.f32 %v333_v9, %v207_v7  ;;  %v585_v13 = vadd.f32 %v362_v10, %v208_v8  ;;  %v221_v7 = vld [vmem:[%s2510_s20 + $0x70] sm:$0xff]  ;;  %v214_v9 = vld [vmem:[%s2510_s20 + $0x38] sm:$0xff] }
 0x125   : > { %v1940_v15 = vmul.f32 -1.442695, %v592_v5 }
 0x126   : > { %1983 = vpow2.f32 %v1941_v11  ;;  %v1933_v14 = vmul.f32 -1.442695, %v585_v13  ;;  %v1932_v34 = vmul.f32 -1.442695, %v584_v12 }
 0x127   : > { %1985 = vtanh.f32 %v584_v12 }
 0x128   : > { %1987 = vpow2.f32 %v1933_v14 }
 0x129   : > { %1989 = vpow2.f32 %v1940_v15 }
 0x12a   : > { %v1982_v19 = vpop.eup %1981  ;;  %v406_v20 = vpop.f32.mrf.mxu2 }
 0x12b   : > { %v435_v21 = vpop.f32.mrf.mxu3  ;;  %v594_v22 = vadd.f32 %v406_v20, %v217_v16  ;;  %v336_v23 = vpop.f32.mrf.mxu0  ;;  %1408 = vrot.lane.b32.xlu0 %v1982_v19, %s2183_s21 }
 0x12c   : > { %v365_v25 = vpop.f32.mrf.mxu1  ;;  %v595_v26 = vadd.f32 %v435_v21, %v218_v17  ;;  %v586_v27 = vadd.f32 %v336_v23, %v209_v18  ;;  %v1984_v28 = vpop.eup %1983  ;;  %v213_v21 = vld [vmem:[%s2510_s20 + $0x30] sm:$0xff] }
 0x12d   : > { %1991 = vtanh.f32 %v594_v22  ;;  %v2521_v29 = vadd.f32 1.0, %v1984_v28  ;;  %v587_v30 = vadd.f32 %v365_v25, %v210_v24  ;;  %v1986_v31 = vpop.eup %1985  ;;  %v1942_v50 = vmul.f32 -1.442695, %v594_v22 }
 0x12e   : > { %1993 = vtanh.f32 %v586_v27  ;;  %v1988_v32 = vpop.eup %1987  ;;  %v1943_v33 = vmul.f32 -1.442695, %v595_v26  ;;  %1400 = vrot.lane.b32.xlu2 %v1986_v31, %s2183_s21  ;;  %v1934_v53 = vmul.f32 -1.442695, %v586_v27  ;;  %v234_v27 = vld [vmem:[%s2510_s20 + $0xd8] sm:$0xff] }
 0x12f   : > { %1995 = vrcp.f32 %v2521_v29  ;;  %v2525_v35 = vadd.f32 1.0, %v1988_v32  ;;  %v1990_v37 = vpop.eup %1989  ;;  %v1935_v38 = vmul.f32 -1.442695, %v587_v30  ;;  %v888_v28 = vand.u32 2147483647, %v2521_v29 }
 0x130   : > { %v2531_v46 = vadd.f32 1.0, %v1990_v37  ;;  %v890_v30 = vand.u32 2147483648, %v2521_v29  ;;  %vm884_vm7 = vweird.f32 %v2521_v29 }
 0x131   : > { %1997 = vrcp.f32 %v2525_v35  ;;  %v768_v11 = vand.u32 2147483647, %v2525_v35  ;;  %v770_v15 = vand.u32 2147483648, %v2525_v35  ;;  %vm764_vm3 = vweird.f32 %v2525_v35 }
 0x132   : > { %v409_v39 = vpop.f32.mrf.mxu2  ;;  %1999 = vpow2.f32 %v1943_v33  ;;  %v222_v33 = vld [vmem:[%s2510_s20 + $0x78] sm:$0xff]  ;;  %vm2595_vm8 = vcmp.eq.f32.partialorder %v888_v28, 8.507059e+37 }
 0x133   : > { %v438_v40 = vpop.f32.mrf.mxu3  ;;  %v1992_v41 = vpop.eup %1991  ;;  %v596_v44 = vadd.f32 %v409_v39, %v219_v36  ;;  %2001 = vpow2.f32 %v1932_v34  ;;  %vm2572_vm5 = vcmp.eq.f32.partialorder %v768_v11, 8.507059e+37 }
 0x134   : > { %v1994_v43 = vpop.eup %1993  ;;  %v368_v45 = vpop.f32.mrf.mxu1  ;;  %1410 = vrot.lane.b32.xlu1 %v1992_v41, %s2183_s21  ;;  %2003 = vpow2.f32 %v1935_v38  ;;  %v597_v51 = vadd.f32 %v438_v40, %v220_v42 }
 0x135   : > { %v339_v48 = vpop.f32.mrf.mxu0  ;;  %1402 = vrot.lane.b32.xlu0 %v1994_v43, %s2183_s21  ;;  %v2535_v49 = vpop.eup %1995  ;;  %2005 = vtanh.f32 %v596_v44  ;;  %v589_v57 = vadd.f32 %v368_v45, %v212_v52  ;;  %v1944_v3 = vmul.f32 -1.442695, %v596_v44  ;;  %v76_v45 = vld [vmem:[#allocation3 + $0x8] sm:$0xff] }
 0x136   : > { %v880_v54 = vmul.f32 %v2535_v49, %v2521_v29  ;;  %v588_v55 = vadd.f32 %v339_v48, %v211_v47  ;;  %2007 = vrcp.f32 %v2531_v46  ;;  %v1945_v60 = vmul.f32 -1.442695, %v597_v51  ;;  %v108_v47 = vld [vmem:[#allocation3 + $0x6] sm:$0xff] }
 0x137   : > { %v2540_v56 = vpop.eup %1997  ;;  %2009 = vpow2.f32 %v1942_v50  ;;  %v1937_v4 = vmul.f32 -1.442695, %v589_v57  ;;  %vm885_vm6 = vweird.f32 %v2535_v49  ;;  %v891_v50 = vor.u32 1.1754944e-38, %v890_v30  ;;  %v80_v30 = vld [vmem:[#allocation3 + $0x30] sm:$0xff] }
 0x138   : > { %v2000_v58 = vpop.eup %1999  ;;  %v760_v59 = vmul.f32 %v2540_v56, %v2525_v35  ;;  %2011 = vpow2.f32 %v1934_v53  ;;  %v881_v1 = vsub.f32 1.0, %v880_v54  ;;  %vm765_vm2 = vweird.f32 %v2540_v56  ;;  %v232_v54 = vld [vmem:[%s2510_s20 + $0xc8] sm:$0xff]  ;;  %vm2607_vm9 = vmor %vm884_vm7, %vm885_vm6 }
 0x139   : > { %v2002_v62 = vpop.eup %2001  ;;  %v2545_v63 = vadd.f32 1.0, %v2000_v58  ;;  %2013 = vtanh.f32 %v588_v55  ;;  %v1936_v17 = vmul.f32 -1.442695, %v588_v55  ;;  %vm2568_vm4 = vmor %vm764_vm3, %vm765_vm2  ;;  %v771_v35 = vor.u32 1.1754944e-38, %v770_v15 }
 0x13a   : > { %v2004_v0 = vpop.eup %2003  ;;  %v761_v2 = vsub.f32 1.0, %v760_v59  ;;  %v412_v8 = vpop.f32.mrf.mxu2  ;;  %v2555_v13 = vadd.f32 1.0, %v2002_v62  ;;  %v882_v18 = vmul.f32 %v2535_v49, %v881_v1 }
 0x13b   : > { %v441_v61 = vpop.f32.mrf.mxu3  ;;  %2015 = vrcp.f32 %v2545_v63  ;;  %v2006_v5 = vpop.eup %2005  ;;  %v2548_v6 = vadd.f32 1.0, %v2004_v0  ;;  %v598_v20 = vadd.f32 %v412_v8, %v221_v7  ;;  %vm914_vm10 = vweird.f32 %v2545_v63 }
 0x13c   : > { %2017 = vpow2.f32 %v1945_v60  ;;  %v371_v10 = vpop.f32.mrf.mxu1  ;;  %v2553_v12 = vpop.eup %2007  ;;  %1412 = vrot.lane.b32.xlu2 %v2006_v5, %s2183_s21  ;;  %v762_v14 = vmul.f32 %v2540_v56, %v761_v2  ;;  %v883_v40 = vadd.f32 %v2535_v49, %v882_v18  ;;  %v599_v44 = vadd.f32 %v441_v61, %v222_v33 }
 0x13d   : > { %v2010_v16 = vpop.eup %2009  ;;  %2019 = vpow2.f32 %v1944_v3  ;;  %v342_v22 = vpop.f32.mrf.mxu0  ;;  %v591_v23 = vadd.f32 %v371_v10, %v214_v9  ;;  %v1946_v61 = vmul.f32 -1.442695, %v598_v20  ;;  %v918_v9 = vand.u32 2147483647, %v2545_v63 }
 0x13e   : > { %v2012_v19 = vpop.eup %2011  ;;  %2021 = vpow2.f32 %v1937_v4  ;;  %v763_v24 = vadd.f32 %v2540_v56, %v762_v14  ;;  %v2580_v32 = vadd.f32 1.0, %v2010_v16  ;;  %v590_v38 = vadd.f32 %v342_v22, %v213_v21  ;;  %v224_v4 = vld [vmem:[%s2510_s20 + $0x88] sm:$0xff]  ;;  %v231_v14 = vld [vmem:[%s2510_s20 + $0xc0] sm:$0xff] }
 0x13f   : > { %v2014_v25 = vpop.eup %2013  ;;  %2023 = vrcp.f32 %v2548_v6  ;;  %v1939_v41 = vmul.f32 -1.442695, %v591_v23  ;;  %v2600_v52 = vadd.f32 1.0, %v2012_v19  ;;  %v887_v60 = vsel %vm2607_vm9, %v2535_v49, %v883_v40  ;;  %v223_v19 = vld [vmem:[%s2510_s20 + $0x80] sm:$0xff] }
 0x140   : > { %1404 = vrot.lane.b32.xlu1 %v2014_v25, %s2183_s21  ;;  %v767_v34 = vsel %vm2568_vm4, %v2540_v56, %v763_v24  ;;  %2025 = vpow2.f32 %v1936_v17  ;;  %v1947_v2 = vmul.f32 -1.442695, %v599_v44  ;;  %v892_v5 = vsel %vm2595_vm8, %v891_v50, %v887_v60  ;;  %v226_v50 = vld [vmem:[%s2510_s20 + $0x98] sm:$0xff] }
 0x141   : > { %v2578_v31 = vpop.eup %2015  ;;  %2027 = vtanh.f32 %v598_v20  ;;  %v772_v42 = vsel %vm2572_vm5, %v771_v35, %v767_v34  ;;  %v1938_v11 = vmul.f32 -1.442695, %v590_v38  ;;  %v1260_v22 = vsub.f32 1.0, %v892_v5 }
 0x142   : > { %v2018_v36 = vpop.eup %2017  ;;  %v910_v37 = vmul.f32 %v2578_v31, %v2545_v63  ;;  %2029 = vrcp.f32 %v2555_v13  ;;  %v1256_v29 = vsub.f32 1.0, %v772_v42  ;;  %v1240_v62 = vmul.f32 %v772_v42, %v108_v47  ;;  %v543_v15 = vpop.f32.mrf.mxu2 }
 0x143   : > { %v572_v39 = vpop.f32.mrf.mxu3  ;;  %v2020_v43 = vpop.eup %2019  ;;  %2031 = vrcp.f32 %v2580_v32  ;;  %v2602_v53 = vadd.f32 1.0, %v2018_v36  ;;  %v920_v23 = vand.u32 2147483648, %v2545_v63  ;;  %v608_v35 = vadd.f32 %v543_v15, %v231_v14  ;;  %v112_v36 = vld [vmem:[#allocation3 + $0x2e] sm:$0xff] }
 0x144   : > { %v2022_v51 = vpop.eup %2021  ;;  %v911_v57 = vsub.f32 1.0, %v910_v37  ;;  %2033 = vtanh.f32 %v590_v38  ;;  %v502_v59 = vpop.f32.mrf.mxu1  ;;  %v1272_v0 = vmul.f32 %v1256_v29, %v76_v45  ;;  %v609_v3 = vadd.f32 %v572_v39, %v232_v54 }
 0x145   : > { %v2611_v56 = vpop.eup %2023  ;;  %v2613_v58 = vadd.f32 1.0, %v2022_v51  ;;  %2035 = vpow2.f32 %v1939_v41  ;;  %v2634_v18 = vadd.f32 1.0, %v2020_v43  ;;  %v473_v20 = vpop.f32.mrf.mxu0  ;;  %v601_v21 = vadd.f32 %v502_v59, %v224_v4  ;;  %v113_v59 = vld [vmem:[#allocation3 + $0x36] sm:$0xff] }
 0x146   : > { %v2026_v1 = vpop.eup %2025  ;;  %v790_v8 = vmul.f32 %v2611_v56, %v2548_v6  ;;  %v1288_v49 = vadd.f32 %v1272_v0, %v1240_v62  ;;  %v912_v16 = vmul.f32 %v2578_v31, %v911_v57  ;;  %v1957_v26 = vmul.f32 -1.442695, %v609_v3  ;;  %v81_v57 = vld [vmem:[#allocation3 + $0x38] sm:$0xff] }
 0x147   : > { %2037 = vrcp.f32 %v2613_v58  ;;  %v2028_v7 = vpop.eup %2027  ;;  %v2639_v25 = vadd.f32 1.0, %v2026_v1  ;;  %vm2644_vm11 = vcmp.eq.f32.partialorder %v918_v9, 8.507059e+37  ;;  %v600_v39 = vadd.f32 %v473_v20, %v223_v19  ;;  %v236_v20 = vld [vmem:[%s2510_s20 + $0xe8] sm:$0xff] }
 0x148   : > { %2039 = vrcp.f32 %v2602_v53  ;;  %v2626_v10 = vpop.eup %2029  ;;  %1414 = vrot.lane.b32.xlu0 %v2028_v7, %s2183_s21  ;;  %1320 = vrot.lane.b32.xlu1 %v1288_v49, %s2182_s13  ;;  %v791_v34 = vsub.f32 1.0, %v790_v8  ;;  %v913_v40 = vadd.f32 %v2578_v31, %v912_v16  ;;  %vm915_vm12 = vweird.f32 %v2578_v31 }
 0x149   : > { %2041 = vrcp.f32 %v2600_v52  ;;  %v2632_v17 = vpop.eup %2031  ;;  %v1949_v42 = vmul.f32 -1.442695, %v601_v21  ;;  %v1276_v44 = vmul.f32 %v1260_v22, %v80_v30  ;;  %vm916_vm13 = vmor %vm914_vm10, %vm915_vm12  ;;  %v921_v45 = vor.u32 1.1754944e-38, %v920_v23 }
 0x14a   : > { %v2034_v24 = vpop.eup %2033  ;;  %2043 = vpow2.f32 %v1946_v61  ;;  %v1244_v54 = vmul.f32 %v892_v5, %v112_v36  ;;  %v917_v29 = vsel %vm916_vm13, %v2578_v31, %v913_v40  ;;  %v792_v60 = vmul.f32 %v2611_v56, %v791_v34 }
 0x14b   : > { %v575_v28 = vpop.f32.mrf.mxu3  ;;  %v2036_v33 = vpop.eup %2035  ;;  %2045 = vpow2.f32 %v1947_v2  ;;  %1406 = vrot.lane.b32.xlu2 %v2034_v24, %s2183_s21  ;;  %v922_v63 = vsel %vm2644_vm11, %v921_v45, %v917_v29  ;;  %v1956_v0 = vmul.f32 -1.442695, %v608_v35  ;;  %vm795_vm14 = vweird.f32 %v2611_v56  ;;  %v77_v29 = vld [vmem:[#allocation3 + $0x10] sm:$0xff] }
 0x14c   : > { %2047 = vpow2.f32 %v1938_v11  ;;  %v611_v43 = vadd.f32 %v575_v28, %v234_v27  ;;  %v505_v51 = vpop.f32.mrf.mxu1  ;;  %v2662_v55 = vadd.f32 1.0, %v2036_v33  ;;  %v1261_v1 = vsub.f32 1.0, %v922_v63  ;;  %v546_v28 = vpop.f32.mrf.mxu2 }
 0x14d   : > { %v2648_v38 = vpop.eup %2037  ;;  %2049 = vpow2.f32 %v1957_v26  ;;  %v603_v3 = vadd.f32 %v505_v51, %v226_v50  ;;  %v1292_v4 = vadd.f32 %v1276_v44, %v1244_v54  ;;  %v1245_v8 = vmul.f32 %v922_v63, %v113_v59  ;;  %v2676_v11 = vpop.f32.mrf.mxu0  ;;  %v228_v50 = vld [vmem:[%s2510_s20 + $0xa8] sm:$0xff] }
 0x14e   : > { %v2652_v41 = vpop.eup %2039  ;;  %v820_v48 = vmul.f32 %v2648_v38, %v2613_v58  ;;  %2051 = vtanh.f32 %v600_v39  ;;  %v1959_v2 = vmul.f32 -1.442695, %v611_v43  ;;  %v1277_v49 = vmul.f32 %v1261_v1, %v81_v57  ;;  %v109_v57 = vld [vmem:[#allocation3 + $0xe] sm:$0xff] }
 0x14f   : > { %v2656_v47 = vpop.eup %2041  ;;  %2053 = vrcp.f32 %v2634_v18  ;;  %v2670_v62 = vmul.f32 %v2652_v41, %v2602_v53  ;;  %v793_v14 = vadd.f32 %v2611_v56, %v792_v60  ;;  %vm794_vm15 = vweird.f32 %v2548_v6 }
 0x150   : > { %v2044_v61 = vpop.eup %2043  ;;  %2055 = vpow2.f32 %v1949_v42  ;;  %v821_v7 = vsub.f32 1.0, %v820_v48  ;;  %v1293_v19 = vadd.f32 %v1277_v49, %v1245_v8  ;;  %v2686_v24 = vmul.f32 -1.442695, %v600_v39  ;;  %vm2694_vm1 = vmor %vm794_vm15, %vm795_vm14 }
 0x151   : > { %v2046_v31 = vpop.eup %2045  ;;  %2057 = vrcp.f32 %v2639_v25  ;;  %v2673_v9 = vadd.f32 1.0, %v2044_v61  ;;  %v941_v23 = vsub.f32 1.0, %v2670_v62  ;;  %v1951_v26 = vmul.f32 -1.442695, %v603_v3 }
 0x152   : > { %v2048_v5 = vpop.eup %2047  ;;  %2059 = vrcp.f32 %v2662_v55  ;;  %v2681_v16 = vadd.f32 1.0, %v2046_v31  ;;  %1330 = vrot.lane.b32.xlu0 %v1293_v19, %s2182_s13  ;;  %v798_v33 = vand.u32 2147483647, %v2548_v6  ;;  %v800_v34 = vand.u32 2147483648, %v2548_v6  ;;  %v233_v6 = vld [vmem:[%s2510_s20 + $0xd0] sm:$0xff] }
 0x153   : > { %1328 = vrot.lane.b32.xlu2 %v1292_v4, %s2182_s13  ;;  %v2050_v15 = vpop.eup %2049  ;;  %2061 = vpow2.f32 %v1956_v0  ;;  %v578_v21 = vpop.f32.mrf.mxu3  ;;  %v822_v36 = vmul.f32 %v2648_v38, %v821_v7  ;;  %v797_v40 = vsel %vm2694_vm1, %v2611_v56, %v793_v14  ;;  %v2710_v43 = vadd.f32 1.0, %v2048_v5  ;;  %v225_v7 = vld [vmem:[%s2510_s20 + $0x90] sm:$0xff] }
 0x154   : > { %v2052_v22 = vpop.eup %2051  ;;  %2063 = vpow2.f32 %v1959_v2  ;;  %v2702_v37 = vadd.f32 1.0, %v2050_v15  ;;  %v613_v39 = vadd.f32 %v578_v21, %v236_v20  ;;  %v508_v44 = vpop.f32.mrf.mxu1  ;;  %v801_v45 = vor.u32 1.1754944e-38, %v800_v34  ;;  %v235_v34 = vld [vmem:[%s2510_s20 + $0xe0] sm:$0xff] }
 0x155   : > { %v2688_v27 = vpop.eup %2053  ;;  %2065 = vtanh.f32 %v608_v35  ;;  %1416 = vrot.lane.b32.xlu1 %v2052_v22, %s2183_s21  ;;  %vm825_vm2 = vweird.f32 %v2648_v38  ;;  %vm799_vm3 = vcmp.eq.f32.partialorder %v798_v33, 8.507059e+37  ;;  %v823_v51 = vadd.f32 %v2648_v38, %v822_v36  ;;  %v479_v8 = vpop.f32.mrf.mxu0 }
 0x156   : > { %v2056_v35 = vpop.eup %2055  ;;  %2067 = vrcp.f32 %v2673_v9  ;;  %vm824_vm4 = vweird.f32 %v2613_v58  ;;  %v802_v59 = vsel %vm799_vm3, %v801_v45, %v797_v40  ;;  %v828_v63 = vand.u32 2147483647, %v2613_v58  ;;  %v549_v36 = vpop.f32.mrf.mxu2 }
 0x157   : > { %v2707_v42 = vpop.eup %2057  ;;  %2069 = vrcp.f32 %v2681_v16  ;;  %v2721_v54 = vadd.f32 1.0, %v2056_v35  ;;  %v830_v60 = vand.u32 2147483648, %v2613_v58  ;;  %v2726_v62 = vadd.f32 %v546_v28, %v233_v6  ;;  %vm2730_vm5 = vmor %vm824_vm4, %vm825_vm2  ;;  %v110_v28 = vld [vmem:[#allocation3 + $0x16] sm:$0xff] }
 0x158   : > { %v2714_v48 = vpop.eup %2059  ;;  %2071 = vpow2.f32 %v1951_v26  ;;  %v1961_v0 = vmul.f32 -1.442695, %v613_v39  ;;  %v1257_v1 = vsub.f32 1.0, %v802_v59  ;;  %v605_v3 = vadd.f32 %v508_v44, %v228_v50  ;;  %v78_v26 = vld [vmem:[#allocation3 + $0x18] sm:$0xff] }
 0x159   : > { %v2719_v56 = vpop.eup %2061  ;;  %2073 = vrcp.f32 %v2702_v37  ;;  %v850_v58 = vmul.f32 %v2714_v48, %v2662_v55  ;;  %v827_v4 = vsel %vm2730_vm5, %v2648_v38, %v823_v51  ;;  %v1241_v49 = vmul.f32 %v802_v59, %v109_v57  ;;  %v230_v57 = vld [vmem:[%s2510_s20 + $0xb8] sm:$0xff] }
 0x15a   : > { %v2064_v61 = vpop.eup %2063  ;;  %2075 = vrcp.f32 %v2710_v43  ;;  %v1273_v14 = vmul.f32 %v1257_v1, %v77_v29  ;;  %v831_v15 = vor.u32 1.1754944e-38, %v830_v60  ;;  %v942_v19 = vmul.f32 %v2652_v41, %v941_v23 }
 0x15b   : > { %v2734_v2 = vpop.eup %2065  ;;  %2077 = vrcp.f32 %v2721_v54  ;;  %v2749_v21 = vadd.f32 1.0, %v2064_v61  ;;  %vm829_vm6 = vcmp.eq.f32.partialorder %v828_v63, 8.507059e+37  ;;  %vm945_vm7 = vweird.f32 %v2652_v41  ;;  %v227_v61 = vld [vmem:[%s2510_s20 + $0xa0] sm:$0xff] }
 0x15c   : > { %v2742_v5 = vpop.eup %2067  ;;  %2079 = vpow2.f32 %v1961_v0  ;;  %v1289_v22 = vadd.f32 %v1273_v14, %v1241_v49  ;;  %v832_v30 = vsel %vm829_vm6, %v831_v15, %v827_v4  ;;  %v943_v33 = vadd.f32 %v2652_v41, %v942_v19  ;;  %v511_v59 = vpop.f32.mrf.mxu1  ;;  %v82_v15 = vld [vmem:[#allocation3 + $0x40] sm:$0xff] }
 0x15d   : > { %v2746_v20 = vpop.eup %2069  ;;  %2081 = vpow2.f32 %v2686_v24  ;;  %v2755_v23 = vadd.f32 %v2676_v11, %v225_v7  ;;  %v1953_v35 = vmul.f32 -1.442695, %v605_v3  ;;  %v1258_v39 = vsub.f32 1.0, %v832_v30  ;;  %v114_v19 = vld [vmem:[#allocation3 + $0x3e] sm:$0xff] }
 0x15e   : > { %v2072_v38 = vpop.eup %2071  ;;  %v851_v6 = vsub.f32 1.0, %v850_v58  ;;  %2083 = vtanh.f32 %v2726_v62  ;;  %1322 = vrot.lane.b32.xlu2 %v1289_v22, %s2182_s13  ;;  %vm944_vm8 = vweird.f32 %v2602_v53  ;;  %v948_v24 = vand.u32 2147483647, %v2602_v53 }
 0x15f   : > { %v2758_v40 = vpop.eup %2073  ;;  %v2766_v11 = vadd.f32 1.0, %v2072_v38  ;;  %v1242_v45 = vmul.f32 %v832_v30, %v110_v28  ;;  %v1274_v50 = vmul.f32 %v1258_v39, %v78_v26  ;;  %vm2770_vm9 = vmor %vm944_vm8, %vm945_vm7  ;;  %v950_v29 = vand.u32 2147483648, %v2602_v53 }
 0x160   : > { %v2764_v44 = vpop.eup %2075  ;;  %v2778_v63 = vmul.f32 %v2746_v20, %v2681_v16  ;;  %2085 = vrcp.f32 %v2749_v21  ;;  %v2781_v60 = vadd.f32 %v549_v36, %v235_v34  ;;  %v947_v0 = vsel %vm2770_vm9, %v2652_v41, %v943_v33  ;;  %v229_v33 = vld [vmem:[%s2510_s20 + $0xb0] sm:$0xff]  ;;  %v482_v34 = vpop.f32.mrf.mxu0  ;;  %v238_v36 = vld [vmem:[%s2510_s20 + $0xf8] sm:$0xff] }
 0x161   : > { %v2787_v1 = vpop.eup %2077  ;;  %v2791_v53 = vmul.f32 %v2758_v40, %v2702_v37  ;;  %2087 = vpow2.f32 %v1953_v35  ;;  %v1290_v31 = vadd.f32 %v1274_v50, %v1242_v45  ;;  %v951_v58 = vor.u32 1.1754944e-38, %v950_v29 }
 0x162   : > { %v2080_v3 = vpop.eup %2079  ;;  %2089 = vtanh.f32 %v2755_v23  ;;  %vm949_vm10 = vcmp.eq.f32.partialorder %v948_v24, 8.507059e+37  ;;  %v607_v4 = vadd.f32 %v511_v59, %v230_v57  ;;  %v852_v7 = vmul.f32 %v2714_v48, %v851_v6 }
 0x163   : > { %v2795_v49 = vpop.eup %2081  ;;  %2091 = vrcp.f32 %v2766_v11  ;;  %v2798_v41 = vadd.f32 1.0, %v2080_v3  ;;  %v2800_v14 = vadd.f32 %v479_v8, %v227_v61  ;;  %1324 = vrot.lane.b32.xlu0 %v1290_v31, %s2182_s13  ;;  %v952_v38 = vsel %vm949_vm10, %v951_v58, %v947_v0  ;;  %v581_v8 = vpop.f32.mrf.mxu3 }
 0x164   : > { %v2084_v22 = vpop.eup %2083  ;;  %v971_v26 = vsub.f32 1.0, %v2778_v63  ;;  %v2806_v28 = vmul.f32 %v2787_v1, %v2721_v54  ;;  %2093 = vtanh.f32 %v2781_v60  ;;  %v1262_v30 = vsub.f32 1.0, %v952_v38 }
 0x165   : > { %v1121_v35 = vsub.f32 1.0, %v2791_v53  ;;  %2095 = vrcp.f32 %v2798_v41  ;;  %v1955_v39 = vmul.f32 -1.442695, %v607_v4  ;;  %v853_v6 = vadd.f32 %v2714_v48, %v852_v7 }
 0x166   : > { %v2814_v24 = vpop.eup %2085  ;;  %v1246_v45 = vmul.f32 %v952_v38, %v114_v19  ;;  %v1278_v50 = vmul.f32 %v1262_v30, %v82_v15  ;;  %1424 = vrot.lane.b32.xlu2 %v2734_v2, %s2183_s21  ;;  %vm855_vm11 = vweird.f32 %v2714_v48  ;;  %v858_v51 = vand.u32 2147483647, %v2662_v55  ;;  %v237_v38 = vld [vmem:[%s2510_s20 + $0xf0] sm:$0xff] }
 0x167   : > { %v2088_v29 = vpop.eup %2087  ;;  %v2820_v57 = vadd.f32 %v482_v34, %v229_v33  ;;  %vm854_vm12 = vweird.f32 %v2662_v55  ;;  %v860_v59 = vand.u32 2147483648, %v2662_v55  ;;  %v615_v63 = vadd.f32 %v581_v8, %v238_v36  ;;  %v111_v34 = vld [vmem:[#allocation3 + $0x1e] sm:$0xff] }
 0x168   : > { %v2090_v61 = vpop.eup %2089  ;;  %v1001_v0 = vsub.f32 1.0, %v2806_v28  ;;  %v2825_v31 = vadd.f32 1.0, %v2088_v29  ;;  %v1294_v58 = vadd.f32 %v1278_v50, %v1246_v45  ;;  %2097 = vpow2.f32 %v1955_v39  ;;  %vm2827_vm13 = vmor %vm854_vm12, %vm855_vm11  ;;  %v552_v28 = vpop.f32.mrf.mxu2 }
 0x169   : > { %v2831_v3 = vpop.eup %2091  ;;  %2099 = vtanh.f32 %v2800_v14  ;;  %v857_v55 = vsel %vm2827_vm13, %v2714_v48, %v853_v6  ;;  %v861_v4 = vor.u32 1.1754944e-38, %v860_v59  ;;  %v1963_v7 = vmul.f32 -1.442695, %v615_v63  ;;  %v79_v48 = vld [vmem:[#allocation3 + $0x20] sm:$0xff] }
 0x16a   : > { %v2837_v15 = vpop.eup %2093  ;;  %v2841_v19 = vmul.f32 %v2814_v24, %v2749_v21  ;;  %2101 = vrcp.f32 %v2825_v31  ;;  %1332 = vrot.lane.b32.xlu1 %v1294_v58, %s2182_s13  ;;  %vm859_vm14 = vcmp.eq.f32.partialorder %v858_v51, 8.507059e+37  ;;  %v972_v30 = vmul.f32 %v2746_v20, %v971_v26 }
 0x16b   : > { %v2847_v33 = vpop.eup %2095  ;;  %1426 = vrot.lane.b32.xlu0 %v2084_v22, %s2183_s21  ;;  %v862_v36 = vsel %vm859_vm14, %v861_v4, %v857_v55  ;;  %2103 = vpow2.f32 %v1963_v7  ;;  %vm974_vm15 = vweird.f32 %v2681_v16  ;;  %vm975_vm1 = vweird.f32 %v2746_v20 }
 0x16c   : > { %v2854_v8 = vmul.f32 %v2831_v3, %v2766_v11  ;;  %v1180_v39 = vmul.f32 %v2847_v33, %v2798_v41  ;;  %2105 = vtanh.f32 %v2820_v57  ;;  %v1259_v26 = vsub.f32 1.0, %v862_v36  ;;  %vm2867_vm2 = vmor %vm974_vm15, %vm975_vm1 }
 0x16d   : > { %v2859_v6 = vadd.f32 %v552_v28, %v237_v38  ;;  %v973_v22 = vadd.f32 %v2746_v20, %v972_v30  ;;  %v978_v45 = vand.u32 2147483647, %v2681_v16  ;;  %v980_v50 = vand.u32 2147483648, %v2681_v16  ;;  %v115_v30 = vld [vmem:[#allocation3 + $0x46] sm:$0xff] }
 0x16e   : > { %v2098_v51 = vpop.eup %2097  ;;  %v1181_v29 = vsub.f32 1.0, %v1180_v39  ;;  %v1243_v59 = vmul.f32 %v862_v36, %v111_v34  ;;  %v1275_v63 = vmul.f32 %v1259_v26, %v79_v48  ;;  %1418 = vrot.lane.b32.xlu2 %v2090_v61, %s2183_s21  ;;  %v1002_v2 = vmul.f32 %v2787_v1, %v1001_v0 }
 0x16f   : > { %v2100_v55 = vpop.eup %2099  ;;  %v2872_v4 = vadd.f32 1.0, %v2098_v51  ;;  %v977_v7 = vsel %vm2867_vm2, %v2746_v20, %v973_v22  ;;  %vm979_vm3 = vcmp.eq.f32.partialorder %v978_v45, 8.507059e+37  ;;  %v981_v38 = vor.u32 1.1754944e-38, %v980_v50  ;;  %v83_v20 = vld [vmem:[#allocation3 + $0x48] sm:$0xff] }
 0x170   : > { %v2877_v28 = vpop.eup %2101  ;;  %v1291_v61 = vadd.f32 %v1275_v63, %v1243_v59  ;;  %v1003_v16 = vadd.f32 %v2787_v1, %v1002_v2  ;;  %vm1004_vm4 = vweird.f32 %v2721_v54  ;;  %vm1005_vm5 = vweird.f32 %v2787_v1  ;;  %v122_v51 = vld [vmem:[#allocation3 + $0x8e] sm:$0xff] }
 0x171   : > { %v2104_v0 = vpop.eup %2103  ;;  %v1151_v48 = vsub.f32 1.0, %v2841_v19  ;;  %v1031_v34 = vsub.f32 1.0, %v2854_v8  ;;  %2107 = vrcp.f32 %v2872_v4  ;;  %v982_v36 = vsel %vm979_vm3, %v981_v38, %v977_v7  ;;  %vm2901_vm6 = vmor %vm1004_vm4, %vm1005_vm5 }
 0x172   : > { %v2885_v39 = vpop.eup %2105  ;;  %1326 = vrot.lane.b32.xlu1 %v1291_v61, %s2182_s13  ;;  %v2888_v26 = vadd.f32 1.0, %v2104_v0  ;;  %2109 = vtanh.f32 %v2859_v6  ;;  %v1263_v22 = vsub.f32 1.0, %v982_v36  ;;  %v1008_v45 = vand.u32 2147483647, %v2721_v54  ;;  %v84_v0 = vld [vmem:[#allocation3 + $0x58] sm:$0xff] }
 0x173   : > { %v2894_v19 = vmul.f32 %v2877_v28, %v2825_v31  ;;  %1420 = vrot.lane.b32.xlu0 %v2100_v55, %s2183_s21  ;;  %v1247_v50 = vmul.f32 %v982_v36, %v115_v30  ;;  %v1010_v59 = vand.u32 2147483648, %v2721_v54  ;;  %v1182_v63 = vmul.f32 %v2847_v33, %v1181_v29  ;;  %v116_v55 = vld [vmem:[#allocation3 + $0x56] sm:$0xff] }
 0x174   : > { %2111 = vrcp.f32 %v2888_v26  ;;  %v1279_v58 = vmul.f32 %v1263_v22, %v83_v20  ;;  %v1007_v2 = vsel %vm2901_vm6, %v2787_v1, %v1003_v16  ;;  %vm1184_vm7 = vweird.f32 %v2798_v41 }
 0x175   : > { %v1011_v7 = vor.u32 1.1754944e-38, %v1010_v59  ;;  %v1183_v38 = vadd.f32 %v2847_v33, %v1182_v63  ;;  %vm1185_vm8 = vweird.f32 %v2847_v33  ;;  %v1188_v61 = vand.u32 2147483647, %v2798_v41 }
 0x176   : > { %v1295_v54 = vadd.f32 %v1279_v58, %v1247_v50  ;;  %vm1009_vm9 = vcmp.eq.f32.partialorder %v1008_v45, 8.507059e+37  ;;  %vm2915_vm10 = vmor %vm1184_vm7, %vm1185_vm8  ;;  %v1190_v30 = vand.u32 2147483648, %v2798_v41  ;;  %v1122_v1 = vmul.f32 %v2758_v40, %v1121_v35 }
 0x177   : > { %v2923_v16 = vpop.eup %2107  ;;  %v1012_v20 = vsel %vm1009_vm9, %v1011_v7, %v1007_v2  ;;  %v1187_v36 = vsel %vm2915_vm10, %v2847_v33, %v1183_v38  ;;  %vm2928_vm11 = vcmp.eq.f32.partialorder %v1188_v61, 8.507059e+37  ;;  %vm1124_vm12 = vweird.f32 %v2702_v37 }
 0x178   : > { %v2110_v45 = vpop.eup %2109  ;;  %v1090_v53 = vmul.f32 %v2923_v16, %v2872_v4  ;;  %1334 = vrot.lane.b32.xlu2 %v1295_v54, %s2182_s13  ;;  %v1248_v41 = vmul.f32 %v1012_v20, %v116_v55  ;;  %v1264_v35 = vsub.f32 1.0, %v1012_v20  ;;  %v1191_v50 = vor.u32 1.1754944e-38, %v1190_v30  ;;  %v120_v20 = vld [vmem:[#allocation3 + $0x7e] sm:$0xff] }
 0x179   : > { %v1123_v59 = vadd.f32 %v2758_v40, %v1122_v1  ;;  %vm1125_vm13 = vweird.f32 %v2758_v40  ;;  %v1128_v33 = vand.u32 2147483647, %v2702_v37  ;;  %v1130_v63 = vand.u32 2147483648, %v2702_v37 }
 0x17a   : > { %v2940_v58 = vpop.eup %2111  ;;  %v1091_v2 = vsub.f32 1.0, %v1090_v53  ;;  %1428 = vrot.lane.b32.xlu1 %v2837_v15, %s2183_s21  ;;  %v1280_v7 = vmul.f32 %v1264_v35, %v84_v0  ;;  %v1192_v55 = vsel %vm2928_vm11, %v1191_v50, %v1187_v36  ;;  %vm2948_vm14 = vmor %vm1124_vm12, %vm1125_vm13  ;;  %v1152_v61 = vmul.f32 %v2814_v24, %v1151_v48  ;;  %v90_v0 = vld [vmem:[#allocation3 + $0x90] sm:$0xff] }
 0x17b   : > { %v1061_v54 = vsub.f32 1.0, %v2894_v19  ;;  %v2956_v29 = vmul.f32 %v2940_v58, %v2888_v26  ;;  %v1270_v30 = vsub.f32 1.0, %v1192_v55  ;;  %v1127_v15 = vsel %vm2948_vm14, %v2758_v40, %v1123_v59  ;;  %v88_v19 = vld [vmem:[#allocation3 + $0x80] sm:$0xff]  ;;  %v87_v40 = vld [vmem:[#allocation3 + $0x70] sm:$0xff] }
 0x17c   : > { %v1296_v1 = vadd.f32 %v1280_v7, %v1248_v41  ;;  %v1254_v37 = vmul.f32 %v1192_v55, %v122_v51  ;;  %v1131_v36 = vor.u32 1.1754944e-38, %v1130_v63  ;;  %v1153_v22 = vadd.f32 %v2814_v24, %v1152_v61  ;;  %v121_v61 = vld [vmem:[#allocation3 + $0x86] sm:$0xff] }
 0x17d   : > { %v1211_v48 = vsub.f32 1.0, %v2956_v29  ;;  %vm1129_vm15 = vcmp.eq.f32.partialorder %v1128_v33, 8.507059e+37  ;;  %vm1154_vm1 = vweird.f32 %v2749_v21  ;;  %vm1155_vm2 = vweird.f32 %v2814_v24 }
 0x17e   : > { %1336 = vrot.lane.b32.xlu0 %v1296_v1, %s2182_s13  ;;  %v1132_v53 = vsel %vm1129_vm15, %v1131_v36, %v1127_v15  ;;  %vm2966_vm3 = vmor %vm1154_vm1, %vm1155_vm2  ;;  %v1158_v41 = vand.u32 2147483647, %v2749_v21  ;;  %v1160_v35 = vand.u32 2147483648, %v2749_v21  ;;  %v1092_v50 = vmul.f32 %v2923_v16, %v1091_v2 }
 0x17f   : > { %v1286_v51 = vmul.f32 %v1270_v30, %v90_v0  ;;  %v1252_v59 = vmul.f32 %v1132_v53, %v120_v20  ;;  %v1268_v33 = vsub.f32 1.0, %v1132_v53  ;;  %v1157_v63 = vsel %vm2966_vm3, %v2814_v24, %v1153_v22  ;;  %v89_v24 = vld [vmem:[#allocation3 + $0x88] sm:$0xff] }
 0x180   : > { %1430 = vrot.lane.b32.xlu2 %v2110_v45, %s2183_s21  ;;  %vm1159_vm4 = vcmp.eq.f32.partialorder %v1158_v41, 8.507059e+37  ;;  %v1161_v7 = vor.u32 1.1754944e-38, %v1160_v35  ;;  %v1093_v55 = vadd.f32 %v2923_v16, %v1092_v50  ;;  %vm1094_vm5 = vweird.f32 %v2872_v4 }
 0x181   : > { %v1284_v38 = vmul.f32 %v1268_v33, %v88_v19  ;;  %vm1095_vm6 = vweird.f32 %v2923_v16  ;;  %v1098_v21 = vand.u32 2147483647, %v2872_v4  ;;  %v1100_v2 = vand.u32 2147483648, %v2872_v4 }
 0x182   : > { %1422 = vrot.lane.b32.xlu1 %v2885_v39, %s2183_s21  ;;  %v1162_v30 = vsel %vm1159_vm4, %v1161_v7, %v1157_v63  ;;  %vm2984_vm7 = vmor %vm1094_vm5, %vm1095_vm6  ;;  %v1032_v15 = vmul.f32 %v2831_v3, %v1031_v34  ;;  %vm1034_vm8 = vweird.f32 %v2766_v11  ;;  %vm1035_vm9 = vweird.f32 %v2831_v3 }
 0x183   : > { %v1302_v1 = vadd.f32 %v1286_v51, %v1254_v37  ;;  %v1300_v0 = vadd.f32 %v1284_v38, %v1252_v59  ;;  %v1269_v4 = vsub.f32 1.0, %v1162_v30  ;;  %v1097_v39 = vsel %vm2984_vm7, %v2923_v16, %v1093_v55  ;;  %vm2998_vm11 = vmor %vm1034_vm8, %vm1035_vm9  ;;  %v119_v16 = vld [vmem:[#allocation3 + $0x6e] sm:$0xff]  ;;  %v117_v59 = vld [vmem:[#allocation3 + $0x5e] sm:$0xff] }
 0x184   : > { %v1253_v20 = vmul.f32 %v1162_v30, %v121_v61  ;;  %v1101_v36 = vor.u32 1.1754944e-38, %v1100_v2  ;;  %v1033_v22 = vadd.f32 %v2831_v3, %v1032_v15  ;;  %v1038_v19 = vand.u32 2147483647, %v2766_v11  ;;  %v85_v61 = vld [vmem:[#allocation3 + $0x60] sm:$0xff] }
 0x185   : > { %v1285_v8 = vmul.f32 %v1269_v4, %v89_v24  ;;  %vm1099_vm10 = vcmp.eq.f32.partialorder %v1098_v21, 8.507059e+37  ;;  %v1040_v37 = vand.u32 2147483648, %v2766_v11  ;;  %v1062_v53 = vmul.f32 %v2877_v28, %v1061_v54 }
 0x186   : > { %1348 = vrot.lane.b32.xlu0 %v1302_v1, %s2182_s13  ;;  %v1102_v41 = vsel %vm1099_vm10, %v1101_v36, %v1097_v39  ;;  %v1037_v35 = vsel %vm2998_vm11, %v2831_v3, %v1033_v22  ;;  %vm1064_vm12 = vweird.f32 %v2825_v31  ;;  %vm1065_vm13 = vweird.f32 %v2877_v28  ;;  %v118_v36 = vld [vmem:[#allocation3 + $0x66] sm:$0xff] }
 0x187   : > { %v1301_v50 = vadd.f32 %v1285_v8, %v1253_v20  ;;  %v1267_v51 = vsub.f32 1.0, %v1102_v41  ;;  %vm1039_vm14 = vcmp.eq.f32.partialorder %v1038_v19, 8.507059e+37  ;;  %v1041_v11 = vor.u32 1.1754944e-38, %v1040_v37  ;;  %vm3023_vm15 = vmor %vm1064_vm12, %vm1065_vm13 }
 0x188   : > { %v1063_v54 = vadd.f32 %v2877_v28, %v1062_v53  ;;  %v1068_v33 = vand.u32 2147483647, %v2825_v31  ;;  %v1070_v63 = vand.u32 2147483648, %v2825_v31  ;;  %v745_v7 = vmul.f32 %v2626_v10, %v2555_v13  ;;  %v1401_v34 = vpop.permute.xlu2 %1400 }
 0x189   : > { %v3016_v3 = vadd.f32 1.0, %v2719_v56  ;;  %1346 = vrot.lane.b32.xlu2 %v1301_v50, %s2182_s13  ;;  %v1251_v55 = vmul.f32 %v1102_v41, %v119_v16  ;;  %v1283_v38 = vmul.f32 %v1267_v51, %v87_v40  ;;  %v1042_v21 = vsel %vm1039_vm14, %v1041_v11, %v1037_v35 }
 0x18a   : > { %1344 = vrot.lane.b32.xlu1 %v1300_v0, %s2182_s13  ;;  %v1249_v24 = vmul.f32 %v1042_v21, %v117_v59  ;;  %v1265_v30 = vsub.f32 1.0, %v1042_v21  ;;  %v1067_v56 = vsel %vm3023_vm15, %v2877_v28, %v1063_v54  ;;  %vm1069_vm1 = vcmp.eq.f32.partialorder %v1068_v33, 8.507059e+37  ;;  %v86_v0 = vld [vmem:[#allocation3 + $0x68] sm:$0xff]  ;;  %v123_v59 = vld [vmem:[#allocation3 + $0x96] sm:$0xff] }
 0x18b   : > { %v1299_v45 = vadd.f32 %v1283_v38, %v1251_v55  ;;  %v1071_v15 = vor.u32 1.1754944e-38, %v1070_v63  ;;  %v746_v1 = vsub.f32 1.0, %v745_v7  ;;  %v753_v4 = vand.u32 2147483647, %v2555_v13 }
 0x18c   : > { %v1281_v39 = vmul.f32 %v1265_v30, %v85_v61  ;;  %v755_v31 = vand.u32 2147483648, %v2555_v13  ;;  %v1212_v20 = vmul.f32 %v2940_v58, %v1211_v48  ;;  %vm1214_vm2 = vweird.f32 %v2888_v26 }
 0x18d   : > { %v1072_v22 = vsel %vm1069_vm1, %v1071_v15, %v1067_v56  ;;  %v747_v28 = vmul.f32 %v2626_v10, %v746_v1  ;;  %vm750_vm3 = vweird.f32 %v2626_v10  ;;  %vm1215_vm4 = vweird.f32 %v2940_v58 }
 0x18e   : > { %1342 = vrot.lane.b32.xlu0 %v1299_v45, %s2182_s13  ;;  %v1297_v19 = vadd.f32 %v1281_v39, %v1249_v24  ;;  %v1266_v8 = vsub.f32 1.0, %v1072_v22  ;;  %vm749_vm5 = vweird.f32 %v2555_v13  ;;  %vm3042_vm6 = vcmp.eq.f32.partialorder %v753_v4, 8.507059e+37  ;;  %vm3046_vm7 = vmor %vm1214_vm2, %vm1215_vm4 }
 0x18f   : > { %v748_v37 = vadd.f32 %v2626_v10, %v747_v28  ;;  %v1213_v53 = vadd.f32 %v2940_v58, %v1212_v20  ;;  %v1218_v40 = vand.u32 2147483647, %v2888_v26  ;;  %v1220_v16 = vand.u32 2147483648, %v2888_v26  ;;  %vm751_vm8 = vmor %vm749_vm5, %vm750_vm3 }
 0x190   : > { %v1250_v41 = vmul.f32 %v1072_v22, %v118_v36  ;;  %v1282_v35 = vmul.f32 %v1266_v8, %v86_v0  ;;  %v756_v13 = vor.u32 1.1754944e-38, %v755_v31  ;;  %v925_v50 = vmul.f32 %v2688_v27, %v2634_v18 }
 0x191   : > { %v752_v51 = vsel %vm751_vm8, %v2626_v10, %v748_v37  ;;  %v1217_v11 = vsel %vm3046_vm7, %v2940_v58, %v1213_v53  ;;  %vm1219_vm9 = vcmp.eq.f32.partialorder %v1218_v40, 8.507059e+37  ;;  %v1221_v54 = vor.u32 1.1754944e-38, %v1220_v16  ;;  %v91_v10 = vld [vmem:[#allocation3 + $0x98] sm:$0xff] }
 0x192   : > { %1338 = vrot.lane.b32.xlu1 %v1297_v19, %s2182_s13  ;;  %v1298_v26 = vadd.f32 %v1282_v35, %v1250_v41  ;;  %v3065_v33 = vsel %vm3042_vm6, %v756_v13, %v752_v51  ;;  %v926_v63 = vsub.f32 1.0, %v925_v50  ;;  %vm930_vm10 = vweird.f32 %v2688_v27 }
 0x193   : > { %v1448_v7 = vmul.f32 %v1401_v34, %v3065_v33  ;;  %v1222_v55 = vsel %vm1219_vm9, %v1221_v54, %v1217_v11  ;;  %v935_v38 = vand.u32 2147483648, %v2634_v18  ;;  %v865_v58 = vmul.f32 %v2553_v12, %v2531_v46 }
 0x194   : > { %1340 = vrot.lane.b32.xlu2 %v1298_v26, %s2182_s13  ;;  %v1255_v61 = vmul.f32 %v1222_v55, %v123_v59  ;;  %v1271_v21 = vsub.f32 1.0, %v1222_v55  ;;  %v927_v2 = vmul.f32 %v2688_v27, %v926_v63  ;;  %v933_v24 = vand.u32 2147483647, %v2634_v18 }
 0x195   : > { %2113 = vrcp.f32 %v3016_v3  ;;  %v1950_v30 = vmul.f32 -1.442695, %v2755_v23  ;;  %v866_v56 = vsub.f32 1.0, %v865_v58  ;;  %vm929_vm11 = vweird.f32 %v2634_v18 }
 0x196   : > { %v1287_v45 = vmul.f32 %v1271_v21, %v91_v10  ;;  %1480 = vrot.lane.b32.xlu0 %v1448_v7, %s2182_s13  ;;  %v928_v15 = vadd.f32 %v2688_v27, %v927_v2  ;;  %v936_v1 = vor.u32 1.1754944e-38, %v935_v38  ;;  %vm931_vm12 = vmor %vm929_vm11, %vm930_vm10  ;;  %v1413_v4 = vpop.permute.xlu2 %1412  ;;  %vm870_vm13 = vweird.f32 %v2553_v12 }
 0x197   : > { %v867_v39 = vmul.f32 %v2553_v12, %v866_v56  ;;  %v875_v31 = vand.u32 2147483648, %v2531_v46  ;;  %v835_v23 = vmul.f32 %v2764_v44, %v2710_v43  ;;  %vm934_vm14 = vcmp.eq.f32.partialorder %v933_v24, 8.507059e+37 }
 0x198   : > { %v1303_v20 = vadd.f32 %v1287_v45, %v1255_v61  ;;  %v932_v0 = vsel %vm931_vm12, %v2688_v27, %v928_v15  ;;  %v873_v18 = vand.u32 2147483647, %v2531_v46  ;;  %vm869_vm15 = vweird.f32 %v2531_v46 }
 0x199   : > { %v3089_v36 = vsel %vm934_vm14, %v936_v1, %v932_v0  ;;  %v868_v22 = vadd.f32 %v2553_v12, %v867_v39  ;;  %v836_v28 = vsub.f32 1.0, %v835_v23  ;;  %2115 = vpow2.f32 %v1950_v30  ;;  %vm871_vm1 = vmor %vm869_vm15, %vm870_vm13 }
 0x19a   : > { %1350 = vrot.lane.b32.xlu1 %v1303_v20, %s2182_s13  ;;  %v1454_v19 = vmul.f32 %v1413_v4, %v3089_v36  ;;  %vm840_vm2 = vweird.f32 %v2764_v44  ;;  %v895_v27 = vmul.f32 %v2632_v17, %v2580_v32  ;;  %v876_v34 = vor.u32 1.1754944e-38, %v875_v31 }
 0x19b   : > { %v3098_v8 = vpop.eup %2113  ;;  %v872_v48 = vsel %vm871_vm1, %v2553_v12, %v868_v22  ;;  %v837_v46 = vmul.f32 %v2764_v44, %v836_v28  ;;  %v843_v37 = vand.u32 2147483647, %v2710_v43  ;;  %vm874_vm3 = vcmp.eq.f32.partialorder %v873_v18, 8.507059e+37 }
 0x19c   : > { %vm839_vm4 = vweird.f32 %v2710_v43  ;;  %v845_v53 = vand.u32 2147483648, %v2710_v43  ;;  %v896_v40 = vsub.f32 1.0, %v895_v27  ;;  %v3105_v16 = vsel %vm874_vm3, %v876_v34, %v872_v48 }
 0x19d   : > { %v1409_v29 = vpop.permute.xlu0 %1408  ;;  %v838_v41 = vadd.f32 %v2764_v44, %v837_v46  ;;  %v905_v35 = vand.u32 2147483648, %v2580_v32  ;;  %v775_v12 = vmul.f32 %v2656_v47, %v2600_v52  ;;  %vm3115_vm5 = vmor %vm839_vm4, %vm840_vm2  ;;  %vm900_vm6 = vweird.f32 %v2632_v17 }
 0x19e   : > { %1492 = vrot.lane.b32.xlu0 %v1454_v19, %s2182_s13  ;;  %v1452_v13 = vmul.f32 %v1409_v29, %v3105_v16  ;;  %v897_v43 = vmul.f32 %v2632_v17, %v896_v40  ;;  %v903_v51 = vand.u32 2147483647, %v2580_v32  ;;  %vm844_vm7 = vcmp.eq.f32.partialorder %v843_v37, 8.507059e+37 }
 0x19f   : > { %v842_v59 = vsel %vm3115_vm5, %v2764_v44, %v838_v41  ;;  %vm899_vm8 = vweird.f32 %v2580_v32  ;;  %v776_v11 = vsub.f32 1.0, %v775_v12  ;;  %v2116_v54 = vpop.eup %2115  ;;  %v846_v26 = vor.u32 1.1754944e-38, %v845_v53 }
 0x1a0   : > { %v898_v63 = vadd.f32 %v2632_v17, %v897_v43  ;;  %v785_v7 = vand.u32 2147483648, %v2600_v52  ;;  %v805_v10 = vmul.f32 %v2707_v42, %v2639_v25  ;;  %vm901_vm9 = vmor %vm899_vm8, %vm900_vm6  ;;  %v906_v38 = vor.u32 1.1754944e-38, %v905_v35 }
 0x1a1   : > { %v777_v58 = vmul.f32 %v2656_v47, %v776_v11  ;;  %vm780_vm10 = vweird.f32 %v2656_v47  ;;  %v783_v44 = vand.u32 2147483647, %v2600_v52  ;;  %v3133_v32 = vsel %vm844_vm7, %v846_v26, %v842_v59 }
 0x1a2   : > { %1488 = vrot.lane.b32.xlu1 %v1452_v13, %s2182_s13  ;;  %v902_v21 = vsel %vm901_vm9, %v2632_v17, %v898_v63  ;;  %vm904_vm11 = vcmp.eq.f32.partialorder %v903_v51, 8.507059e+37  ;;  %v806_v2 = vsub.f32 1.0, %v805_v10  ;;  %vm779_vm12 = vweird.f32 %v2600_v52 }
 0x1a3   : > { %v3138_v30 = vsel %vm904_vm11, %v906_v38, %v902_v21  ;;  %v778_v56 = vadd.f32 %v2656_v47, %v777_v58  ;;  %vm781_vm13 = vmor %vm779_vm12, %vm780_vm10  ;;  %v786_v1 = vor.u32 1.1754944e-38, %v785_v7  ;;  %v955_v17 = vmul.f32 %v2742_v5, %v2673_v9 }
 0x1a4   : > { %v807_v4 = vmul.f32 %v2707_v42, %v806_v2  ;;  %v3147_v39 = vadd.f32 1.0, %v2795_v49  ;;  %vm784_vm14 = vcmp.eq.f32.partialorder %v783_v44, 8.507059e+37  ;;  %vm810_vm15 = vweird.f32 %v2707_v42 }
 0x1a5   : > { %v1407_v61 = vpop.permute.xlu2 %1406  ;;  %v782_v31 = vsel %vm781_vm13, %v2656_v47, %v778_v56  ;;  %v3157_v0 = vadd.f32 1.0, %v2116_v54  ;;  %v815_v49 = vand.u32 2147483648, %v2639_v25  ;;  %v956_v18 = vsub.f32 1.0, %v955_v17 }
 0x1a6   : > { %v1411_v55 = vpop.permute.xlu1 %1410  ;;  %v1451_v24 = vmul.f32 %v1407_v61, %v3133_v32  ;;  %v3151_v23 = vsel %vm784_vm14, %v786_v1, %v782_v31  ;;  %v808_v20 = vadd.f32 %v2707_v42, %v807_v4  ;;  %2117 = vrcp.f32 %v3147_v39 }
 0x1a7   : > { %v1453_v45 = vmul.f32 %v1411_v55, %v3138_v30  ;;  %v1403_v15 = vpop.permute.xlu0 %1402  ;;  %vm809_vm1 = vweird.f32 %v2639_v25  ;;  %v813_v47 = vand.u32 2147483647, %v2639_v25  ;;  %v1962_v22 = vmul.f32 -1.442695, %v2859_v6 }
 0x1a8   : > { %1486 = vrot.lane.b32.xlu0 %v1451_v24, %s2182_s13  ;;  %v1449_v52 = vmul.f32 %v1403_v15, %v3151_v23  ;;  %vm811_vm2 = vmor %vm809_vm1, %vm810_vm15  ;;  %2119 = vrcp.f32 %v3157_v0  ;;  %v816_v19 = vor.u32 1.1754944e-38, %v815_v49  ;;  %v957_v27 = vmul.f32 %v2742_v5, %v956_v18 }
 0x1a9   : > { %1490 = vrot.lane.b32.xlu2 %v1453_v45, %s2182_s13  ;;  %v812_v28 = vsel %vm811_vm2, %v2707_v42, %v808_v20  ;;  %vm814_vm3 = vcmp.eq.f32.partialorder %v813_v47, 8.507059e+37  ;;  %v1105_v29 = vmul.f32 %v3098_v8, %v3016_v3  ;;  %v1958_v6 = vmul.f32 -1.442695, %v2726_v62 }
 0x1aa   : > { %1482 = vrot.lane.b32.xlu1 %v1449_v52, %s2182_s13  ;;  %v3172_v25 = vsel %vm814_vm3, %v816_v19, %v812_v28  ;;  %2121 = vpow2.f32 %v1962_v22  ;;  %v958_v37 = vadd.f32 %v2742_v5, %v957_v27  ;;  %vm959_vm4 = vweird.f32 %v2673_v9 }
 0x1ab   : > { %vm960_vm5 = vweird.f32 %v2742_v5  ;;  %v965_v53 = vand.u32 2147483648, %v2673_v9  ;;  %v1106_v40 = vsub.f32 1.0, %v1105_v29  ;;  %v963_v35 = vand.u32 2147483647, %v2673_v9 }
 0x1ac   : > { %v3174_v46 = vpop.eup %2117  ;;  %2123 = vpow2.f32 %v1958_v6  ;;  %vm961_vm6 = vmor %vm959_vm4, %vm960_vm5  ;;  %v1952_v9 = vmul.f32 -1.442695, %v2800_v14  ;;  %vm1109_vm8 = vweird.f32 %v3016_v3  ;;  %vm1110_vm9 = vweird.f32 %v3098_v8 }
 0x1ad   : > { %v3170_v48 = vpop.permute.xlu2 %1328  ;;  %v985_v62 = vmul.f32 %v3174_v46, %v3147_v39  ;;  %v962_v12 = vsel %vm961_vm6, %v2742_v5, %v958_v37  ;;  %v966_v50 = vor.u32 1.1754944e-38, %v965_v53  ;;  %v1107_v43 = vmul.f32 %v3098_v8, %v1106_v40  ;;  %vm1111_vm10 = vmor %vm1109_vm8, %vm1110_vm9 }
 0x1ae   : > { %v3183_v41 = vpop.eup %2119  ;;  %vm964_vm7 = vcmp.eq.f32.partialorder %v963_v35, 8.507059e+37  ;;  %v1115_v38 = vand.u32 2147483648, %v3016_v3  ;;  %v1113_v58 = vand.u32 2147483647, %v3016_v3  ;;  %2125 = vpow2.f32 %v1952_v9 }
 0x1af   : > { %v1015_v51 = vmul.f32 %v3183_v41, %v3157_v0  ;;  %v986_v59 = vsub.f32 1.0, %v985_v62  ;;  %v3192_v11 = vsel %vm964_vm7, %v966_v50, %v962_v12  ;;  %v1108_v10 = vadd.f32 %v3098_v8, %v1107_v43 }
 0x1b0   : > { %v2122_v13 = vpop.eup %2121  ;;  %v1116_v24 = vor.u32 1.1754944e-38, %v1115_v38  ;;  %vm989_vm11 = vweird.f32 %v3147_v39  ;;  %vm990_vm12 = vweird.f32 %v3174_v46  ;;  %v1960_v3 = vmul.f32 -1.442695, %v2781_v60 }
 0x1b1   : > { %v3195_v26 = vadd.f32 1.0, %v2122_v13  ;;  %v1016_v55 = vsub.f32 1.0, %v1015_v51  ;;  %v987_v14 = vmul.f32 %v3174_v46, %v986_v59  ;;  %v1112_v21 = vsel %vm1111_vm10, %v3098_v8, %v1108_v10  ;;  %vm991_vm1 = vmor %vm989_vm11, %vm990_vm12 }
 0x1b2   : > { %v1405_v34 = vpop.permute.xlu1 %1404  ;;  %v2124_v7 = vpop.eup %2123  ;;  %vm1114_vm13 = vcmp.eq.f32.partialorder %v1113_v58, 8.507059e+37  ;;  %v995_v45 = vand.u32 2147483648, %v3147_v39  ;;  %v993_v8 = vand.u32 2147483647, %v3147_v39  ;;  %vm1019_vm14 = vweird.f32 %v3157_v0 }
 0x1b3   : > { %v1450_v42 = vmul.f32 %v1405_v34, %v3172_v25  ;;  %v3209_v61 = vadd.f32 1.0, %v2124_v7  ;;  %2127 = vrcp.f32 %v3195_v26  ;;  %v1017_v2 = vmul.f32 %v3183_v41, %v1016_v55 }
 0x1b4   : > { %v988_v56 = vadd.f32 %v3174_v46, %v987_v14  ;;  %v3220_v15 = vsel %vm1114_vm13, %v1116_v24, %v1112_v21  ;;  %vm1020_vm15 = vweird.f32 %v3183_v41  ;;  %v2126_v60 = vpop.eup %2125  ;;  %v1025_v31 = vand.u32 2147483648, %v3157_v0 }
 0x1b5   : > { %1484 = vrot.lane.b32.xlu2 %v1450_v42, %s2182_s13  ;;  %2129 = vrcp.f32 %v3209_v61  ;;  %v1018_v17 = vadd.f32 %v3183_v41, %v1017_v2  ;;  %v1023_v39 = vand.u32 2147483647, %v3157_v0  ;;  %v996_v49 = vor.u32 1.1754944e-38, %v995_v45  ;;  %vm1021_vm2 = vmor %vm1019_vm14, %vm1020_vm15 }
 0x1b6   : > { %v992_v52 = vsel %vm991_vm1, %v3174_v46, %v988_v56  ;;  %2131 = vpow2.f32 %v1960_v3  ;;  %vm994_vm3 = vcmp.eq.f32.partialorder %v993_v8, 8.507059e+37  ;;  %v3231_v18 = vadd.f32 1.0, %v2126_v60 }
 0x1b7   : > { %v1022_v47 = vsel %vm1021_vm2, %v3183_v41, %v1018_v17  ;;  %v3234_v22 = vsel %vm994_vm3, %v996_v49, %v992_v52  ;;  %v1026_v27 = vor.u32 1.1754944e-38, %v1025_v31  ;;  %v1954_v34 = vmul.f32 -1.442695, %v2820_v57 }
 0x1b8   : > { %v3197_v63 = vpop.permute.xlu2 %1322  ;;  %vm1024_vm4 = vcmp.eq.f32.partialorder %v1023_v39, 8.507059e+37  ;;  %2133 = vrcp.f32 %v3231_v18  ;;  %vm1199_vm5 = vweird.f32 %v3195_v26  ;;  %v1205_v43 = vand.u32 2147483648, %v3195_v26 }
 0x1b9   : > { %v2128_v20 = vpop.eup %2127  ;;  %v3239_v0 = vsel %vm1024_vm4, %v1026_v27, %v1022_v47  ;;  %2135 = vpow2.f32 %v1954_v34  ;;  %v1203_v9 = vand.u32 2147483647, %v3195_v26  ;;  %vm1139_vm8 = vweird.f32 %v3209_v61 }
 0x1ba   : > { %v1415_v54 = vpop.permute.xlu0 %1414  ;;  %v3207_v44 = vpop.permute.xlu1 %1320  ;;  %v1195_v46 = vmul.f32 %v2128_v20, %v3195_v26  ;;  %vm1200_vm6 = vweird.f32 %v2128_v20  ;;  %v1206_v38 = vor.u32 1.1754944e-38, %v1205_v43  ;;  %v1145_v26 = vand.u32 2147483648, %v3209_v61 }
 0x1bb   : > { %v1455_v5 = vmul.f32 %v1415_v54, %v3192_v11  ;;  %v2130_v19 = vpop.eup %2129  ;;  %vm3259_vm7 = vmor %vm1199_vm5, %vm1200_vm6  ;;  %vm1204_vm10 = vcmp.eq.f32.partialorder %v1203_v9, 8.507059e+37  ;;  %v1143_v2 = vand.u32 2147483647, %v3209_v61  ;;  %vm1049_vm13 = vweird.f32 %v3231_v18 }
 0x1bc   : > { %v2132_v42 = vpop.eup %2131  ;;  %v1135_v53 = vmul.f32 %v2130_v19, %v3209_v61  ;;  %v1196_v40 = vsub.f32 1.0, %v1195_v46  ;;  %vm1140_vm9 = vweird.f32 %v2130_v19  ;;  %v1055_v49 = vand.u32 2147483648, %v3231_v18 }
 0x1bd   : > { %1494 = vrot.lane.b32.xlu1 %v1455_v5, %s2182_s13  ;;  %v3246_v57 = vadd.f32 1.0, %v2132_v42  ;;  %vm1141_vm11 = vmor %vm1139_vm8, %vm1140_vm9  ;;  %vm1144_vm12 = vcmp.eq.f32.partialorder %v1143_v2, 8.507059e+37  ;;  %v1053_v47 = vand.u32 2147483647, %v3231_v18 }
 0x1be   : > { %v1136_v35 = vsub.f32 1.0, %v1135_v53  ;;  %v2134_v62 = vpop.eup %2133  ;;  %v1197_v12 = vmul.f32 %v2128_v20, %v1196_v40 }
 0x1bf   : > { %2137 = vrcp.f32 %v3246_v57  ;;  %v2136_v13 = vpop.eup %2135  ;;  %v1045_v59 = vmul.f32 %v2134_v62, %v3231_v18  ;;  %vm1050_vm14 = vweird.f32 %v2134_v62  ;;  %vm1054_vm1 = vcmp.eq.f32.partialorder %v1053_v47, 8.507059e+37 }
 0x1c0   : > { %v1425_v1 = vpop.permute.xlu2 %1424  ;;  %v1137_v51 = vmul.f32 %v2130_v19, %v1136_v35  ;;  %v1198_v54 = vadd.f32 %v2128_v20, %v1197_v12  ;;  %v3257_v5 = vadd.f32 1.0, %v2136_v13  ;;  %vm1051_vm15 = vmor %vm1049_vm13, %vm1050_vm14  ;;  %vm1169_vm2 = vweird.f32 %v3246_v57 }
 0x1c1   : > { %v1460_v4 = vmul.f32 %v1425_v1, %v3220_v15  ;;  %v1046_v58 = vsub.f32 1.0, %v1045_v59  ;;  %v1175_v18 = vand.u32 2147483648, %v3246_v57  ;;  %v1173_v40 = vand.u32 2147483647, %v3246_v57 }
 0x1c2   : > { %v1138_v14 = vadd.f32 %v2130_v19, %v1137_v51  ;;  %v1202_v21 = vsel %vm3259_vm7, %v2128_v20, %v1198_v54  ;;  %2139 = vrcp.f32 %v3257_v5  ;;  %vm1079_vm6 = vweird.f32 %v3257_v5 }
 0x1c3   : > { %1504 = vrot.lane.b32.xlu0 %v1460_v4, %s2182_s13  ;;  %v3272_v56 = vsel %vm1204_vm10, %v1206_v38, %v1202_v21  ;;  %v1047_v1 = vmul.f32 %v2134_v62, %v1046_v58  ;;  %v1146_v4 = vor.u32 1.1754944e-38, %v1145_v26  ;;  %v1176_v12 = vor.u32 1.1754944e-38, %v1175_v18 }
 0x1c4   : > { %v3248_v41 = vpop.permute.xlu0 %1330  ;;  %v1142_v45 = vsel %vm1141_vm11, %v2130_v19, %v1138_v14  ;;  %vm1174_vm5 = vcmp.eq.f32.partialorder %v1173_v40, 8.507059e+37  ;;  %v1085_v54 = vand.u32 2147483648, %v3257_v5  ;;  %v1369_v40 = vmul.f32 %v3197_v63, %v3151_v23 }
 0x1c5   : > { %v2138_v55 = vpop.eup %2137  ;;  %v3277_v60 = vsel %vm1144_vm12, %v1146_v4, %v1142_v45  ;;  %v1048_v39 = vadd.f32 %v2134_v62, %v1047_v1  ;;  %v1373_v1 = vmul.f32 %v3248_v41, %v3138_v30 }
 0x1c6   : > { %v1165_v24 = vmul.f32 %v2138_v55, %v3246_v57  ;;  %vm1170_vm3 = vweird.f32 %v2138_v55  ;;  %v1083_v57 = vand.u32 2147483647, %v3257_v5  ;;  %v1086_v38 = vor.u32 1.1754944e-38, %v1085_v54 }
 0x1c7   : > { %v1417_v28 = vpop.permute.xlu1 %1416  ;;  %v1052_v27 = vsel %vm1051_vm15, %v2134_v62, %v1048_v39  ;;  %vm1171_vm4 = vmor %vm1169_vm2, %vm1170_vm3 }
 0x1c8   : > { %v1456_v29 = vmul.f32 %v1417_v28, %v3234_v22  ;;  %v1419_v6 = vpop.permute.xlu2 %1418  ;;  %v1166_v61 = vsub.f32 1.0, %v1165_v24  ;;  %v2140_v52 = vpop.eup %2139  ;;  %vm1084_vm9 = vcmp.eq.f32.partialorder %v1083_v57, 8.507059e+37 }
 0x1c9   : > { %v1457_v37 = vmul.f32 %v1419_v6, %v3239_v0  ;;  %v1075_v19 = vmul.f32 %v2140_v52, %v3257_v5  ;;  %vm1080_vm7 = vweird.f32 %v2140_v52 }
 0x1ca   : > { %1496 = vrot.lane.b32.xlu2 %v1456_v29, %s2182_s13  ;;  %v1167_v28 = vmul.f32 %v2138_v55, %v1166_v61  ;;  %v1056_v29 = vor.u32 1.1754944e-38, %v1055_v49  ;;  %vm1081_vm8 = vmor %vm1079_vm6, %vm1080_vm7 }
 0x1cb   : > { %1498 = vrot.lane.b32.xlu0 %v1457_v37, %s2182_s13  ;;  %v1076_v37 = vsub.f32 1.0, %v1075_v19 }
 0x1cc   : > { %v3289_v46 = vsel %vm1054_vm1, %v1056_v29, %v1052_v27  ;;  %v1168_v42 = vadd.f32 %v2138_v55, %v1167_v28 }
 0x1cd   : > { %v1077_v62 = vmul.f32 %v2140_v52, %v1076_v37 }
 0x1ce   : > { %v1172_v35 = vsel %vm1171_vm4, %v2138_v55, %v1168_v42 }
 0x1cf   : > { %v3295_v13 = vsel %vm1174_vm5, %v1176_v12, %v1172_v35  ;;  %v1078_v59 = vadd.f32 %v2140_v52, %v1077_v62 }
 0x1d1   : > { %v1082_v55 = vsel %vm1081_vm8, %v2140_v52, %v1078_v59  ;;  %v1368_v52 = vmul.f32 %v3207_v44, %v3065_v33 }
 0x1d2   : > { %v3252_v50 = vpop.permute.xlu2 %1334  ;;  %v3306_v14 = vsel %vm1084_vm9, %v1086_v38, %v1082_v55 }
 0x1d5   : > { %v3263_v10 = vpop.permute.xlu0 %1324 }
 0x1d6   : > { %v1370_v44 = vmul.f32 %v3263_v10, %v3172_v25 }
 0x1da   : > { %v1431_v3 = vpop.permute.xlu2 %1430 }
 0x1db   : > { %v1463_v8 = vmul.f32 %v1431_v3, %v3272_v56  ;;  %v1640_v3 = vlaneseq }
 0x1dc   : > { %v3275_v17 = vpop.permute.xlu1 %1332 }
 0x1dd   : > { %v1427_v31 = vpop.permute.xlu0 %1426  ;;  %1510 = vrot.lane.b32.xlu0 %v1463_v8, %s2182_s13  ;;  %v1641_v4 = vshrl.u32 %v1640_v3, 7 }
 0x1de   : > { %v1461_v20 = vmul.f32 %v1427_v31, %v3277_v60  ;;  %v1647_v31 = vstv %s1968_s23 }
 0x1df   : > { %vm3325_vm10 = vcmp.lt.s32.totalorder %v1641_v4, %v1647_v31  ;;  %v1642_v10 = vadd.s32 8, %v1641_v4  ;;  %v1643_v62 = vadd.s32 16, %v1641_v4  ;;  %v1644_v38 = vadd.s32 24, %v1641_v4 }
 0x1e0   : > { %1506 = vrot.lane.b32.xlu1 %v1461_v20, %s2182_s13 }
 0x1e1   : > { %vm3349_vm11 = vcmp.lt.s32.totalorder %v1642_v10, %v1647_v31  ;;  %vm3355_vm12 = vcmp.lt.s32.totalorder %v1643_v62, %v1647_v31  ;;  %vm3368_vm13 = vcmp.lt.s32.totalorder %v1644_v38, %v1647_v31 }
 0x1e3   : > { %v3304_v7 = vpop.permute.xlu2 %1346 }
 0x1e4   : > { %v3286_v34 = vpop.permute.xlu1 %1326 }
 0x1e5   : > { %v1421_v6 = vpop.permute.xlu0 %1420 }
 0x1e6   : > { %v1458_v53 = vmul.f32 %v1421_v6, %v3289_v46  ;;  %v1372_v6 = vmul.f32 %v3170_v48, %v3105_v16 }
 0x1e8   : > { %1500 = vrot.lane.b32.xlu1 %v1458_v53, %s2182_s13 }
 0x1ec   : > { %v1429_v43 = vpop.permute.xlu1 %1428 }
 0x1ed   : > { %v1462_v51 = vmul.f32 %v1429_v43, %v3295_v13  ;;  %v1374_v43 = vmul.f32 %v3275_v17, %v3089_v36 }
 0x1ee   : > { %v3312_v2 = vpop.permute.xlu2 %1340 }
 0x1ef   : > { %1508 = vrot.lane.b32.xlu2 %v1462_v51, %s2182_s13  ;;  %v1378_v38 = vmul.f32 %v3312_v2, %v3289_v46 }
 0x1f0   : > { %v3302_v9 = vpop.permute.xlu0 %1336 }
 0x1f4   : > { %v1423_v58 = vpop.permute.xlu1 %1422 }
 0x1f5   : > { %v1459_v21 = vmul.f32 %v1423_v58, %v3306_v14 }
 0x1f7   : > { %1502 = vrot.lane.b32.xlu2 %v1459_v21, %s2182_s13  ;;  %v1371_v21 = vmul.f32 %v3286_v34, %v3133_v32 }
 0x1f8   : > { %v3310_v26 = vpop.permute.xlu0 %1348 }
 0x1fc   : > { %v3314_v5 = vpop.permute.xlu1 %1344 }
 0x200   : > { %v3317_v24 = vpop.permute.xlu0 %1342 }
 0x203   : > { %v1491_v45 = vpop.permute.xlu2 %1490 }
 0x204   : > { %v3321_v8 = vpop.permute.xlu1 %1338  ;;  %v1533_v61 = vadd.f32 %v1491_v45, %v1373_v1  ;;  %v1376_v45 = vmul.f32 %v3302_v9, %v3234_v22 }
 0x206   : > { %2141 = vtanh.f32 %v1533_v61  ;;  %v1673_v34 = vsel %vm3349_vm11, %v1533_v61, 0.0 }
 0x208   : > { %v1481_v20 = vpop.permute.xlu0 %1480 }
 0x209   : > { %v1528_v49 = vadd.f32 %v1481_v20, %v1368_v52 }
 0x20b   : > { %2143 = vtanh.f32 %v1528_v49  ;;  %v1668_v47 = vsel %vm3325_vm10, %v1528_v49, 0.0 }
 0x20c   : > { %v3331_v41 = vpop.permute.xlu1 %1350  ;;  %1780 = vrot.lane.b32.xlu0 %v1668_v47, %s2184_s24  ;;  %v2142_v27 = vpop.eup %2141 }
 0x20f   : > { %v1485_v28 = vpop.permute.xlu2 %1484 }
 0x210   : > { %v1530_v19 = vadd.f32 %v1485_v28, %v1370_v44  ;;  %v1493_v35 = vpop.permute.xlu0 %1492  ;;  %v1375_v28 = vmul.f32 %v3252_v50, %v3192_v11  ;;  %v1380_v44 = vmul.f32 %v3314_v5, %v3220_v15  ;;  %v1377_v5 = vmul.f32 %v3321_v8, %v3239_v0 }
 0x211   : > { %v2144_v29 = vpop.eup %2143  ;;  %v1534_v54 = vadd.f32 %v1493_v35, %v1374_v43  ;;  %v1382_v8 = vmul.f32 %v3310_v26, %v3295_v13  ;;  %v1381_v43 = vmul.f32 %v3304_v7, %v3277_v60 }
 0x212   : > { %1576 = vrot.lane.b32.xlu1 %v2144_v29, %s2183_s21  ;;  %2145 = vtanh.f32 %v1530_v19  ;;  %v1670_v61 = vsel %vm3355_vm12, %v1530_v19, 0.0 }
 0x213   : > { %v1674_v17 = vsel %vm3355_vm12, %v1534_v54, 0.0 }
 0x214   : > { %1586 = vrot.lane.b32.xlu0 %v2142_v27, %s2183_s21  ;;  %v1489_v42 = vpop.permute.xlu1 %1488 }
 0x215   : > { %v1532_v37 = vadd.f32 %v1489_v42, %v1372_v6 }
 0x217   : > { %2147 = vtanh.f32 %v1532_v37  ;;  %v1672_v53 = vsel %vm3325_vm10, %v1532_v37, 0.0 }
 0x218   : > { %v2146_v18 = vpop.eup %2145 }
 0x21a   : > { %1788 = vrot.lane.b32.xlu1 %v1672_v53, %s2184_s24  ;;  %v1487_v55 = vpop.permute.xlu0 %1486 }
 0x21b   : > { %v1531_v1 = vadd.f32 %v1487_v55, %v1371_v21 }
 0x21c   : > { %1580 = vrot.lane.b32.xlu0 %v2146_v18, %s2183_s21  ;;  %v1483_v48 = vpop.permute.xlu1 %1482 }
 0x21d   : > { %v2148_v12 = vpop.eup %2147  ;;  %v1529_v51 = vadd.f32 %v1483_v48, %v1369_v40  ;;  %v1671_v4 = vsel %vm3368_vm13, %v1531_v1, 0.0 }
 0x21e   : > { %1584 = vrot.lane.b32.xlu2 %v2148_v12, %s2183_s21  ;;  %v1379_v12 = vmul.f32 %v3317_v24, %v3306_v14  ;;  %v1383_v24 = vmul.f32 %v3331_v41, %v3272_v56 }
 0x21f   : > { %2149 = vtanh.f32 %v1529_v51  ;;  %v1669_v63 = vsel %vm3349_vm11, %v1529_v51, 0.0 }
 0x220   : > { %2151 = vtanh.f32 %v1534_v54 }
 0x221   : > { %2153 = vtanh.f32 %v1531_v1 }
 0x222   : > { %1782 = vrot.lane.b32.xlu1 %v1669_v63, %s2184_s24 }
 0x224   : > { %1792 = vrot.lane.b32.xlu0 %v1674_v17, %s2184_s24  ;;  %v1497_v3 = vpop.permute.xlu2 %1496 }
 0x225   : > { %v2150_v58 = vpop.eup %2149  ;;  %v1536_v49 = vadd.f32 %v1497_v3, %v1376_v45 }
 0x226   : > { %1578 = vrot.lane.b32.xlu2 %v2150_v58, %s2183_s21  ;;  %v2152_v20 = vpop.eup %2151 }
 0x227   : > { %2155 = vtanh.f32 %v1536_v49  ;;  %v2154_v9 = vpop.eup %2153  ;;  %v1676_v19 = vsel %vm3325_vm10, %v1536_v49, 0.0 }
 0x22a   : > { %1588 = vrot.lane.b32.xlu1 %v2152_v20, %s2183_s21 }
 0x22c   : > { %1786 = vrot.lane.b32.xlu0 %v1671_v4, %s2184_s24 }
 0x22d   : > { %v2156_v47 = vpop.eup %2155 }
 0x22e   : > { %1790 = vrot.lane.b32.xlu2 %v1673_v34, %s2184_s24 }
 0x22f   : > { %v1495_v31 = vpop.permute.xlu1 %1494 }
 0x230   : > { %v1535_v27 = vadd.f32 %v1495_v31, %v1375_v28 }
 0x232   : > { %1582 = vrot.lane.b32.xlu1 %v2154_v9, %s2183_s21  ;;  %v1675_v42 = vsel %vm3368_vm13, %v1535_v27, 0.0 }
 0x234   : > { %1592 = vrot.lane.b32.xlu0 %v2156_v47, %s2183_s21 }
 0x235   : > { %v1505_v29 = vpop.permute.xlu0 %1504 }
 0x236   : > { %1784 = vrot.lane.b32.xlu2 %v1670_v61, %s2184_s24  ;;  %v1540_v6 = vadd.f32 %v1505_v29, %v1380_v44 }
 0x238   : > { %2157 = vtanh.f32 %v1540_v6  ;;  %v1680_v50 = vsel %vm3325_vm10, %v1540_v6, 0.0 }
 0x239   : > { %2159 = vtanh.f32 %v1535_v27 }
 0x23a   : > { %1794 = vrot.lane.b32.xlu1 %v1675_v42, %s2184_s24 }
 0x23c   : > { %1804 = vrot.lane.b32.xlu0 %v1680_v50, %s2184_s24 }
 0x23d   : > { %v1499_v37 = vpop.permute.xlu0 %1498 }
 0x23e   : > { %1796 = vrot.lane.b32.xlu2 %v1676_v19, %s2184_s24  ;;  %v1537_v53 = vadd.f32 %v1499_v37, %v1377_v5  ;;  %v2158_v18 = vpop.eup %2157 }
 0x23f   : > { %v2160_v40 = vpop.eup %2159 }
 0x240   : > { %2161 = vtanh.f32 %v1537_v53  ;;  %v1677_v10 = vsel %vm3349_vm11, %v1537_v53, 0.0 }
 0x242   : > { %1600 = vrot.lane.b32.xlu1 %v2158_v18, %s2183_s21 }
 0x244   : > { %1798 = vrot.lane.b32.xlu0 %v1677_v10, %s2184_s24 }
 0x246   : > { %1590 = vrot.lane.b32.xlu2 %v2160_v40, %s2183_s21  ;;  %v2162_v35 = vpop.eup %2161 }
 0x249   : > { %v1509_v48 = vpop.permute.xlu2 %1508 }
 0x24a   : > { %v3406_v62 = vadd.f32 %v1509_v48, %v1382_v8  ;;  %1594 = vrot.lane.b32.xlu1 %v2162_v35, %s2183_s21 }
 0x24c   : > { %2163 = vtanh.f32 %v3406_v62 }
 0x24f   : > { %v1511_v55 = vpop.permute.xlu0 %1510 }
 0x250   : > { %v3422_v3 = vadd.f32 %v1511_v55, %v1383_v24 }
 0x251   : > { %v1503_v51 = vpop.permute.xlu2 %1502 }
 0x252   : > { %v2164_v54 = vpop.eup %2163  ;;  %v1539_v63 = vadd.f32 %v1503_v51, %v1379_v12  ;;  %v1507_v17 = vpop.permute.xlu1 %1506 }
 0x253   : > { %1604 = vrot.lane.b32.xlu0 %v2164_v54, %s2183_s21  ;;  %v3415_v26 = vadd.f32 %v1507_v17, %v1381_v43 }
 0x254   : > { %2165 = vtanh.f32 %v1539_v63  ;;  %v1679_v20 = vsel %vm3368_vm13, %v1539_v63, 0.0 }
 0x255   : > { %2167 = vtanh.f32 %v3415_v26 }
 0x25a   : > { %v2166_v58 = vpop.eup %2165  ;;  %v1501_v7 = vpop.permute.xlu1 %1500 }
 0x25b   : > { %v2168_v21 = vpop.eup %2167  ;;  %1598 = vrot.lane.b32.xlu0 %v2166_v58, %s2183_s21  ;;  %v1538_v45 = vadd.f32 %v1501_v7, %v1378_v38 }
 0x25c   : > { %1602 = vrot.lane.b32.xlu2 %v2168_v21, %s2183_s21 }
 0x25d   : > { %2169 = vtanh.f32 %v1538_v45  ;;  %v1678_v1 = vsel %vm3355_vm12, %v1538_v45, 0.0 }
 0x25e   : > { %1800 = vrot.lane.b32.xlu1 %v1678_v1, %s2184_s24  ;;  %2171 = vtanh.f32 %v3422_v3 }
 0x263   : > { %v2170_v2 = vpop.eup %2169 }
 0x264   : > { %1596 = vrot.lane.b32.xlu2 %v2170_v2, %s2183_s21  ;;  %v2172_v41 = vpop.eup %2171 }
 0x266   : > { %1606 = vrot.lane.b32.xlu1 %v2172_v41, %s2183_s21 }
 0x26c   : > { %1802 = vrot.lane.b32.xlu2 %v1679_v20, %s2184_s24 }
 0x278   : > { %v1585_v49 = vpop.permute.xlu2 %1584 }
 0x279   : > { %v1628_v4 = vmul.f32 %v1585_v49, %v3105_v16 }
 0x27b   : > { %v1656_v34 = vsel %vm3325_vm10, %v1628_v4, 0.0 }
 0x27c   : > { %1708 = vrot.lane.b32.xlu0 %v1656_v34, %s2182_s13 }
 0x27e   : > { %v1781_v9 = vpop.permute.xlu0 %1780 }
 0x27f   : > { %1828 = vst.msk [vmem:[#allocation3 + $0x8] sm:$0xff] %vm13_vm0, %v1781_v9 }
 0x280   : > { %1863 = vst.msk [vmem:[%s3445_s28] sm:$0xff] %vm13_vm0, %v1781_v9  ;;  %v1579_v16 = vpop.permute.xlu2 %1578  ;;  %v1681_v9 = vsel %vm3349_vm11, %v3415_v26, 0.0 }
 0x281   : > { %v1625_v31 = vmul.f32 %v1579_v16, %v3151_v23 }
 0x283   : > { %v1653_v47 = vsel %vm3349_vm11, %v1625_v31, 0.0 }
 0x284   : > { %v1577_v28 = vpop.permute.xlu1 %1576  ;;  %1702 = vrot.lane.b32.xlu0 %v1653_v47, %s2182_s13 }
 0x285   : > { %v1624_v44 = vmul.f32 %v1577_v28, %v3065_v33 }
 0x286   : > { %v1587_v27 = vpop.permute.xlu0 %1586 }
 0x287   : > { %v1652_v29 = vsel %vm3325_vm10, %v1624_v44, 0.0  ;;  %v1629_v61 = vmul.f32 %v1587_v27, %v3138_v30 }
 0x288   : > { %1700 = vrot.lane.b32.xlu2 %v1652_v29, %s2182_s13  ;;  %v1791_v6 = vpop.permute.xlu2 %1790 }
 0x289   : > { %v1657_v23 = vsel %vm3349_vm11, %v1629_v61, 0.0  ;;  %1833 = vst.msk [vmem:[#allocation3 + $0x38] sm:$0xff] %vm13_vm0, %v1791_v6 }
 0x28a   : > { %1710 = vrot.lane.b32.xlu1 %v1657_v23, %s2182_s13  ;;  %1868 = vst.msk [vmem:[%s3445_s28 + $0x28] sm:$0xff] %vm13_vm0, %v1791_v6 }
 0x28c   : > { %v1789_v33 = vpop.permute.xlu1 %1788 }
 0x28d   : > { %1832 = vst.msk [vmem:[#allocation3 + $0x30] sm:$0xff] %vm13_vm0, %v1789_v33 }
 0x28e   : > { %v1581_v42 = vpop.permute.xlu0 %1580  ;;  %1867 = vst.msk [vmem:[%s3445_s28 + $0x20] sm:$0xff] %vm13_vm0, %v1789_v33 }
 0x28f   : > { %v1626_v30 = vmul.f32 %v1581_v42, %v3172_v25 }
 0x290   : > { %v1785_v50 = vpop.permute.xlu2 %1784 }
 0x291   : > { %v1654_v5 = vsel %vm3355_vm12, %v1626_v30, 0.0  ;;  %1830 = vst.msk [vmem:[#allocation3 + $0x18] sm:$0xff] %vm13_vm0, %v1785_v50 }
 0x292   : > { %1704 = vrot.lane.b32.xlu1 %v1654_v5, %s2182_s13  ;;  %1865 = vst.msk [vmem:[%s3445_s28 + $0x10] sm:$0xff] %vm13_vm0, %v1785_v50 }
 0x294   : > { %v1783_v37 = vpop.permute.xlu1 %1782 }
 0x295   : > { %1829 = vst.msk [vmem:[#allocation3 + $0x10] sm:$0xff] %vm13_vm0, %v1783_v37 }
 0x296   : > { %v1793_v19 = vpop.permute.xlu0 %1792  ;;  %1864 = vst.msk [vmem:[%s3445_s28 + $0x8] sm:$0xff] %vm13_vm0, %v1783_v37 }
 0x297   : > { %1834 = vst.msk [vmem:[#allocation3 + $0x40] sm:$0xff] %vm13_vm0, %v1793_v19 }
 0x298   : > { %1869 = vst.msk [vmem:[%s3445_s28 + $0x30] sm:$0xff] %vm13_vm0, %v1793_v19  ;;  %v1797_v25 = vpop.permute.xlu2 %1796 }
 0x299   : > { %1836 = vst.msk [vmem:[#allocation3 + $0x58] sm:$0xff] %vm13_vm0, %v1797_v25 }
 0x29a   : > { %1871 = vst.msk [vmem:[%s3445_s28 + $0x40] sm:$0xff] %vm13_vm0, %v1797_v25 }
 0x29c   : > { %v1589_v53 = vpop.permute.xlu1 %1588 }
 0x29d   : > { %v1630_v18 = vmul.f32 %v1589_v53, %v3089_v36 }
 0x29e   : > { %v1787_v10 = vpop.permute.xlu0 %1786 }
 0x29f   : > { %1831 = vst.msk [vmem:[#allocation3 + $0x20] sm:$0xff] %vm13_vm0, %v1787_v10  ;;  %v1658_v40 = vsel %vm3355_vm12, %v1630_v18, 0.0 }
 0x2a0   : > { %1866 = vst.msk [vmem:[%s3445_s28 + $0x18] sm:$0xff] %vm13_vm0, %v1787_v10  ;;  %1712 = vrot.lane.b32.xlu2 %v1658_v40, %s2182_s13  ;;  %v1591_v8 = vpop.permute.xlu2 %1590 }
 0x2a1   : > { %v1631_v35 = vmul.f32 %v1591_v8, %v3192_v11 }
 0x2a3   : > { %v1659_v48 = vsel %vm3368_vm13, %v1631_v35, 0.0 }
 0x2a4   : > { %v1583_v12 = vpop.permute.xlu1 %1582  ;;  %1714 = vrot.lane.b32.xlu0 %v1659_v48, %s2182_s13 }
 0x2a5   : > { %v1627_v36 = vmul.f32 %v1583_v12, %v3133_v32 }
 0x2a6   : > { %v1593_v43 = vpop.permute.xlu0 %1592 }
 0x2a7   : > { %v1632_v51 = vmul.f32 %v1593_v43, %v3234_v22  ;;  %v1655_v54 = vsel %vm3368_vm13, %v1627_v36, 0.0 }
 0x2a8   : > { %1706 = vrot.lane.b32.xlu2 %v1655_v54, %s2182_s13 }
 0x2a9   : > { %v1660_v11 = vsel %vm3325_vm10, %v1632_v51, 0.0 }
 0x2aa   : > { %1716 = vrot.lane.b32.xlu1 %v1660_v11, %s2182_s13 }
 0x2ac   : > { %v1795_v63 = vpop.permute.xlu1 %1794 }
 0x2ad   : > { %1835 = vst.msk [vmem:[#allocation3 + $0x48] sm:$0xff] %vm13_vm0, %v1795_v63 }
 0x2ae   : > { %v1805_v17 = vpop.permute.xlu0 %1804  ;;  %1870 = vst.msk [vmem:[%s3445_s28 + $0x38] sm:$0xff] %vm13_vm0, %v1795_v63 }
 0x2af   : > { %1840 = vst.msk [vmem:[#allocation3 + $0x80] sm:$0xff] %vm13_vm0, %v1805_v17 }
 0x2b0   : > { %1875 = vst.msk [vmem:[%s3445_s28 + $0x60] sm:$0xff] %vm13_vm0, %v1805_v17 }
 0x2b4   : > { %v1601_v32 = vpop.permute.xlu1 %1600 }
 0x2b5   : > { %v1636_v22 = vmul.f32 %v1601_v32, %v3220_v15 }
 0x2b6   : > { %v1603_v55 = vpop.permute.xlu2 %1602  ;;  %v1799_v38 = vpop.permute.xlu0 %1798 }
 0x2b7   : > { %v1637_v24 = vmul.f32 %v1603_v55, %v3277_v60  ;;  %1837 = vst.msk [vmem:[#allocation3 + $0x60] sm:$0xff] %vm13_vm0, %v1799_v38  ;;  %v1664_v58 = vsel %vm3325_vm10, %v1636_v22, 0.0 }
 0x2b8   : > { %1872 = vst.msk [vmem:[%s3445_s28 + $0x48] sm:$0xff] %vm13_vm0, %v1799_v38  ;;  %1724 = vrot.lane.b32.xlu2 %v1664_v58, %s2182_s13 }
 0x2b9   : > { %v1665_v7 = vsel %vm3349_vm11, %v1637_v24, 0.0 }
 0x2ba   : > { %1726 = vrot.lane.b32.xlu0 %v1665_v7, %s2182_s13 }
 0x2bc   : > { %v1595_v15 = vpop.permute.xlu1 %1594 }
 0x2bd   : > { %v1633_v21 = vmul.f32 %v1595_v15, %v3239_v0 }
 0x2be   : > { %v1597_v45 = vpop.permute.xlu2 %1596 }
 0x2bf   : > { %v1634_v60 = vmul.f32 %v1597_v45, %v3289_v46  ;;  %v1661_v39 = vsel %vm3349_vm11, %v1633_v21, 0.0  ;;  %v1683_v46 = vsel %vm3368_vm13, %v3422_v3, 0.0 }
 0x2c0   : > { %1718 = vrot.lane.b32.xlu2 %v1661_v39, %s2182_s13 }
 0x2c1   : > { %v1662_v1 = vsel %vm3355_vm12, %v1634_v60, 0.0 }
 0x2c2   : > { %1720 = vrot.lane.b32.xlu0 %v1662_v1, %s2182_s13 }
 0x2c5   : > { %v1605_v2 = vpop.permute.xlu0 %1604 }
 0x2c6   : > { %v1638_v41 = vmul.f32 %v1605_v2, %v3295_v13  ;;  %v1803_v20 = vpop.permute.xlu2 %1802 }
 0x2c7   : > { %1839 = vst.msk [vmem:[#allocation3 + $0x70] sm:$0xff] %vm13_vm0, %v1803_v20 }
 0x2c8   : > { %1874 = vst.msk [vmem:[%s3445_s28 + $0x58] sm:$0xff] %vm13_vm0, %v1803_v20  ;;  %v1666_v0 = vsel %vm3355_vm12, %v1638_v41, 0.0 }
 0x2c9   : > { %1728 = vrot.lane.b32.xlu1 %v1666_v0, %s2182_s13 }
 0x2ca   : > { %1810 = vrot.lane.b32.xlu0 %v1683_v46, %s2184_s24 }
 0x2cd   : > { %v1599_v49 = vpop.permute.xlu0 %1598 }
 0x2ce   : > { %v1635_v13 = vmul.f32 %v1599_v49, %v3306_v14 }
 0x2d0   : > { %v1663_v4 = vsel %vm3368_vm13, %v1635_v13, 0.0  ;;  %v1801_v34 = vpop.permute.xlu1 %1800 }
 0x2d1   : > { %1722 = vrot.lane.b32.xlu1 %v1663_v4, %s2182_s13  ;;  %1838 = vst.msk [vmem:[#allocation3 + $0x68] sm:$0xff] %vm13_vm0, %v1801_v34 }
 0x2d2   : > { %1873 = vst.msk [vmem:[%s3445_s28 + $0x50] sm:$0xff] %vm13_vm0, %v1801_v34 }
 0x2d8   : > { %v1607_v3 = vpop.permute.xlu1 %1606 }
 0x2d9   : > { %1806 = vrot.lane.b32.xlu1 %v1681_v9, %s2184_s24  ;;  %v1639_v16 = vmul.f32 %v1607_v3, %v3272_v56  ;;  %v1682_v56 = vsel %vm3355_vm12, %v3406_v62, 0.0 }
 0x2db   : > { %v1667_v14 = vsel %vm3368_vm13, %v1639_v16, 0.0 }
 0x2dc   : > { %1730 = vrot.lane.b32.xlu2 %v1667_v14, %s2182_s13 }
 0x2e2   : > { %v1701_v59 = vpop.permute.xlu2 %1700 }
 0x2e3   : > { %1748 = vst.msk [vmem:[#allocation2 + $0x8] sm:$0xff] %vm13_vm0, %v1701_v59 }
 0x2e4   : > { %1846 = vst.msk [vmem:[%s3559_s4] sm:$0xff] %vm13_vm0, %v1701_v59  ;;  %1808 = vrot.lane.b32.xlu2 %v1682_v56, %s2184_s24 }
 0x2ee   : > { %v1709_v52 = vpop.permute.xlu0 %1708 }
 0x2ef   : > { %1752 = vst.msk [vmem:[#allocation2 + $0x30] sm:$0xff] %vm13_vm0, %v1709_v52 }
 0x2f0   : > { %1850 = vst.msk [vmem:[%s3559_s4 + $0x20] sm:$0xff] %vm13_vm0, %v1709_v52 }
 0x2f6   : > { %v1703_v26 = vpop.permute.xlu0 %1702 }
 0x2f7   : > { %1749 = vst.msk [vmem:[#allocation2 + $0x10] sm:$0xff] %vm13_vm0, %v1703_v26 }
 0x2f8   : > { %1847 = vst.msk [vmem:[%s3559_s4 + $0x8] sm:$0xff] %vm13_vm0, %v1703_v26 }
 0x2fa   : > { %v1713_v31 = vpop.permute.xlu2 %1712 }
 0x2fb   : > { %1754 = vst.msk [vmem:[#allocation2 + $0x40] sm:$0xff] %vm13_vm0, %v1713_v31 }
 0x2fc   : > { %v1711_v57 = vpop.permute.xlu1 %1710  ;;  %1852 = vst.msk [vmem:[%s3559_s4 + $0x30] sm:$0xff] %vm13_vm0, %v1713_v31 }
 0x2fd   : > { %1753 = vst.msk [vmem:[#allocation2 + $0x38] sm:$0xff] %vm13_vm0, %v1711_v57 }
 0x2fe   : > { %1851 = vst.msk [vmem:[%s3559_s4 + $0x28] sm:$0xff] %vm13_vm0, %v1711_v57 }
 0x302   : > { %v1707_v62 = vpop.permute.xlu2 %1706 }
 0x303   : > { %1751 = vst.msk [vmem:[#allocation2 + $0x20] sm:$0xff] %vm13_vm0, %v1707_v62 }
 0x304   : > { %v1705_v47 = vpop.permute.xlu1 %1704  ;;  %1849 = vst.msk [vmem:[%s3559_s4 + $0x18] sm:$0xff] %vm13_vm0, %v1707_v62 }
 0x305   : > { %1750 = vst.msk [vmem:[#allocation2 + $0x18] sm:$0xff] %vm13_vm0, %v1705_v47 }
 0x306   : > { %1848 = vst.msk [vmem:[%s3559_s4 + $0x10] sm:$0xff] %vm13_vm0, %v1705_v47 }
 0x312   : > { %v1725_v28 = vpop.permute.xlu2 %1724 }
 0x313   : > { %1760 = vst.msk [vmem:[#allocation2 + $0x80] sm:$0xff] %vm13_vm0, %v1725_v28 }
 0x314   : > { %1858 = vst.msk [vmem:[%s3559_s4 + $0x60] sm:$0xff] %vm13_vm0, %v1725_v28 }
 0x316   : > { %v1715_v44 = vpop.permute.xlu0 %1714 }
 0x317   : > { %1755 = vst.msk [vmem:[#allocation2 + $0x48] sm:$0xff] %vm13_vm0, %v1715_v44 }
 0x318   : > { %1853 = vst.msk [vmem:[%s3559_s4 + $0x38] sm:$0xff] %vm13_vm0, %v1715_v44 }
 0x31a   : > { %v1719_v27 = vpop.permute.xlu2 %1718 }
 0x31b   : > { %1757 = vst.msk [vmem:[#allocation2 + $0x60] sm:$0xff] %vm13_vm0, %v1719_v27 }
 0x31c   : > { %v1717_v29 = vpop.permute.xlu1 %1716  ;;  %1855 = vst.msk [vmem:[%s3559_s4 + $0x48] sm:$0xff] %vm13_vm0, %v1719_v27 }
 0x31d   : > { %1756 = vst.msk [vmem:[#allocation2 + $0x58] sm:$0xff] %vm13_vm0, %v1717_v29 }
 0x31e   : > { %1854 = vst.msk [vmem:[%s3559_s4 + $0x40] sm:$0xff] %vm13_vm0, %v1717_v29 }
 0x32c   : > { %v1727_v61 = vpop.permute.xlu0 %1726 }
 0x32d   : > { %1761 = vst.msk [vmem:[#allocation2 + $0x88] sm:$0xff] %vm13_vm0, %v1727_v61 }
 0x32e   : > { %1859 = vst.msk [vmem:[%s3559_s4 + $0x68] sm:$0xff] %vm13_vm0, %v1727_v61 }
 0x334   : > { %v1721_v6 = vpop.permute.xlu0 %1720 }
 0x335   : > { %1758 = vst.msk [vmem:[#allocation2 + $0x68] sm:$0xff] %vm13_vm0, %v1721_v6 }
 0x336   : > { %1856 = vst.msk [vmem:[%s3559_s4 + $0x50] sm:$0xff] %vm13_vm0, %v1721_v6  ;;  %v1731_v23 = vpop.permute.xlu2 %1730 }
 0x337   : > { %1763 = vst.msk [vmem:[#allocation2 + $0x98] sm:$0xff] %vm13_vm0, %v1731_v23 }
 0x338   : > { %1861 = vst.msk [vmem:[%s3559_s4 + $0x78] sm:$0xff] %vm13_vm0, %v1731_v23 }
 0x33b   : > { %v1729_v33 = vpop.permute.xlu1 %1728 }
 0x33c   : > { %1762 = vst.msk [vmem:[#allocation2 + $0x90] sm:$0xff] %vm13_vm0, %v1729_v33  ;;  %v1811_v42 = vpop.permute.xlu0 %1810 }
 0x33d   : > { %1860 = vst.msk [vmem:[%s3559_s4 + $0x70] sm:$0xff] %vm13_vm0, %v1729_v33 }
 0x33e   : > { %1843 = vst.msk [vmem:[#allocation3 + $0x98] sm:$0xff] %vm13_vm0, %v1811_v42  ;;  %v1809_v30 = vpop.permute.xlu2 %1808 }
 0x33f   : > { %1878 = vst.msk [vmem:[%s3445_s28 + $0x78] sm:$0xff] %vm13_vm0, %v1811_v42 }
 0x340   : > { %1842 = vst.msk [vmem:[#allocation3 + $0x90] sm:$0xff] %vm13_vm0, %v1809_v30 }
 0x341   : > { %1877 = vst.msk [vmem:[%s3445_s28 + $0x70] sm:$0xff] %vm13_vm0, %v1809_v30 }
 0x343   : > { %v1723_v50 = vpop.permute.xlu1 %1722 }
 0x344   : > { %1759 = vst.msk [vmem:[#allocation2 + $0x70] sm:$0xff] %vm13_vm0, %v1723_v50 }
 0x345   : > { %1857 = vst.msk [vmem:[%s3559_s4 + $0x58] sm:$0xff] %vm13_vm0, %v1723_v50 }
 0x349   :  { %58 = sbr.rel (!%p56_p0) target bundleno = 41 (0x29), region = 46 }
 0x34b   : > { %v1807_v5 = vpop.permute.xlu1 %1806 }
 0x34c   : > { %1841 = vst.msk [vmem:[#allocation3 + $0x88] sm:$0xff] %vm13_vm0, %v1807_v5 }
 0x34d   : > { %1876 = vst.msk [vmem:[%s3445_s28 + $0x68] sm:$0xff] %vm13_vm0, %v1807_v5 }

</bundles_post_ra>
